<compile_context>
chip_gen: v7x
topology: tpu7x:2x2x1
jax: 0.10.0
libtpu: 0.0.40
codegen_flags: <defaults>
</compile_context>

<pallas_src>
import jax
import jax.numpy as jnp
from jax.experimental import pallas as pl
from jax.experimental.pallas import tpu as pltpu

# ----------------------- configuration (matches DiscreteSAC.__init__) ----------------------
O_DIM = 32           # o_dim
A_DIM = 8            # a_dim
Z_MAP_DIM = 9        # z_map_dim (default 9)
N_CRITIC = 1         # n_critic (default 1)
HIDDEN = 128         # SoftModuleBlock hidden size (ctor args 3/4 = 128)
N_LAYERS = 4         # routed layers   (ctor arg 5 = 4)
N_MODULES = 4        # modules / layer (ctor arg 6 = 4)
EMB_DIM = Z_MAP_DIM + 1              # concat(z_map, collision_prob)
IN_DIM = O_DIM + EMB_DIM             # 42
IN_PAD = 64                          # zero-padded input width (clean MXU/bf16 tiling)
OUT_PAD = 128                        # lane-dense output slab: Q in lanes 0:A, P in lanes A:2A

BATCH = 16

# ----------------------- per-net bf16 weight slab layout (SLAB_ROWS, SLAB_COLS) ------------
SLAB_COLS = N_MODULES * HIDDEN                 # 512
W_IN_R0 = 0                                    # rows 0:64,  cols 0:256 = block-diag [wb | we]
WMOD_R0 = IN_PAD                               # rows 64:576, layer l at rows 64+128*l (512 cols)
TAIL_R0 = IN_PAD + N_LAYERS * HIDDEN           # rows 576:704, all 128-input-row weights
SLAB_ROWS = TAIL_R0 + HIDDEN                   # 704
WRT_COL = 0                                    # (H, L*M)  routing logits weight
WA2_COL = 16                                   # (H, A)    advantage head layer 2 (critic only)
WO_COL = 128                                   # (H, H)    softmodule output (policy: first A cols)
HEAD1_COL = 256                                # (H, H+1)  fused [wa1 | wv]       (critic only)

# ----------------------- per-net f32 bias vector layout (128-aligned segment starts) -------
B_IN_OFF = 0                                            # [bb | be]   len 2H = 256
B_MOD_OFF = 2 * HIDDEN                                  # bmod        len L*M*H = 2048
B_RT_OFF = B_MOD_OFF + N_LAYERS * N_MODULES * HIDDEN    # brt         len L*M   (pad 128)
B_OUT_OFF = B_RT_OFF + 128                              # bo          len <=H   (pad 128)
B_HEAD1_OFF = B_OUT_OFF + 128                           # [ba1 | bv]  len H+1   (pad 256)
B_A2_OFF = B_HEAD1_OFF + 256                            # ba2         len A     (pad 128)
BIAS_LEN = B_A2_OFF + 128                               # 2944


# --------------------------------------- kernel --------------------------------------------
def _mm(x, w):
    """MXU matmul: bf16 operands, f32 accumulation."""
    return jnp.dot(x.astype(jnp.bfloat16), w, preferred_element_type=jnp.float32)


def _softmodule_trunk(ozc, slab_ref, bias_ref):
    """Shared soft-modularization trunk -> (B, HIDDEN) features.

    For the policy net, wo / bo are zero-padded to HIDDEN columns, so the first A_DIM
    columns of the result hold the policy logits."""
    w_in = slab_ref[W_IN_R0:W_IN_R0 + IN_PAD, 0:2 * HIDDEN]               # (64, 256)
    h0 = jax.nn.relu(_mm(ozc, w_in) + bias_ref[:, B_IN_OFF:B_IN_OFF + 2 * HIDDEN])
    x = h0[:, :HIDDEN]                      # base features  (B, H)
    e = h0[:, HIDDEN:2 * HIDDEN]            # task embedding (B, H)

    # all routing logits in one matmul (loop-invariant)
    wrt = slab_ref[TAIL_R0:TAIL_R0 + HIDDEN, WRT_COL:WRT_COL + N_LAYERS * N_MODULES]
    r_all = _mm(e, wrt) + bias_ref[:, B_RT_OFF:B_RT_OFF + N_LAYERS * N_MODULES]  # (B, L*M)
    # hoisted routing softmaxes: off the serial x-dependence chain, overlap with matmuls
    p_all = [jax.nn.softmax(r_all[:, l * N_MODULES:(l + 1) * N_MODULES], axis=-1)
             for l in range(N_LAYERS)]

    for l in range(N_LAYERS):
        wmod_l = slab_ref[WMOD_R0 + l * HIDDEN:WMOD_R0 + (l + 1) * HIDDEN, :]     # (H, M*H)
        bmod_l = bias_ref[:, B_MOD_OFF + l * N_MODULES * HIDDEN:
                             B_MOD_OFF + (l + 1) * N_MODULES * HIDDEN]
        hm = jax.nn.relu(_mm(x, wmod_l) + bmod_l)          # one wide MXU matmul per layer
        p_l = p_all[l]
        acc = p_l[:, 0:1] * hm[:, 0:HIDDEN]
        for m in range(1, N_MODULES):
            acc = acc + p_l[:, m:m + 1] * hm[:, m * HIDDEN:(m + 1) * HIDDEN]
        x = acc

    wo = slab_ref[TAIL_R0:TAIL_R0 + HIDDEN, WO_COL:WO_COL + HIDDEN]        # (H, H)
    return _mm(x, wo) + bias_ref[:, B_OUT_OFF:B_OUT_OFF + HIDDEN]          # (B, H)


def _make_fused_kernel(n_critic):
    """Grid axis 0 iterates nets: steps 0..n_critic-1 = critics, step n_critic = policy."""

    def kernel(ozc_ref, slab_ref, bias_ref, out_ref):
        step = pl.program_id(0)
        ozc = ozc_ref[...]                                     # (B, IN_PAD) f32
        feat = _softmodule_trunk(ozc, slab_ref, bias_ref)      # (B, HIDDEN)

        @pl.when(step == 0)
        def _():
            out_ref[...] = jnp.zeros_like(out_ref)             # hygiene for padded lanes

        @pl.when(step < n_critic)                              # ---- critic: dueling Q head
        def _():
            whead = slab_ref[TAIL_R0:TAIL_R0 + HIDDEN,
                             HEAD1_COL:HEAD1_COL + HIDDEN + 1]            # [wa1 | wv]
            h1 = _mm(feat, whead) + bias_ref[:, B_HEAD1_OFF:B_HEAD1_OFF + HIDDEN + 1]
            a1 = jax.nn.relu(h1[:, :HIDDEN])                              # (B, H)
            value = h1[:, HIDDEN:HIDDEN + 1]                              # (B, 1)
            wa2 = slab_ref[TAIL_R0:TAIL_R0 + HIDDEN, WA2_COL:WA2_COL + A_DIM]
            adv = _mm(a1, wa2) + bias_ref[:, B_A2_OFF:B_A2_OFF + A_DIM]   # (B, A)
            adv = adv - jnp.mean(adv, axis=-1, keepdims=True)
            q = adv + value
            q_prev = out_ref[:, 0:A_DIM]                       # output block is VMEM-resident
            out_ref[:, 0:A_DIM] = jnp.where(step == 0, q, jnp.minimum(q_prev, q))

        @pl.when(step == n_critic)                             # ---- policy: softmax of logits
        def _():
            out_ref[:, A_DIM:2 * A_DIM] = jax.nn.softmax(feat[:, :A_DIM], axis=-1)

    return kernel


# --------------------------------------- wrapper -------------------------------------------
def discrete_sac_forward(packed, o, z_map, collision_prob):
    """Equivalent of DiscreteSAC.forward -> (Q, P)."""
    b = o.shape[0]
    ozc = jnp.concatenate(
        [o, z_map, collision_prob, jnp.zeros((b, IN_PAD - IN_DIM), o.dtype)], axis=-1)
    slabs, biases = packed["slabs"], packed["biases"]
    n_nets = slabs.shape[0]                                    # n_critic + 1

    out = pl.pallas_call(
        _make_fused_kernel(n_nets - 1),
        out_shape=jax.ShapeDtypeStruct((b, OUT_PAD), jnp.float32),
        grid=(n_nets,),
        in_specs=[
            pl.BlockSpec((b, IN_PAD), lambda i: (0, 0)),                      # shared input
            pl.BlockSpec((None, SLAB_ROWS, SLAB_COLS), lambda i: (i, 0, 0)),  # per-net weights
            pl.BlockSpec((None, 1, BIAS_LEN), lambda i: (i, 0, 0)),           # per-net biases
        ],
        out_specs=pl.BlockSpec((b, OUT_PAD), lambda i: (0, 0)),               # resident slab
        compiler_params=pltpu.CompilerParams(dimension_semantics=("arbitrary",)),
    )(ozc, slabs, biases)
    return out[:, :A_DIM], out[:, A_DIM:2 * A_DIM]


# --------------------------------- deterministic init --------------------------------------
def _orth(key, shape):
    return jax.nn.initializers.orthogonal()(key, shape, jnp.float32)


def _init_softmodule(key, in_dim, emb_dim, out_dim):
    keys = jax.random.split(key, 3 + N_LAYERS * (N_MODULES + 1))
    it = iter(keys)
    return dict(
        wb=_orth(next(it), (in_dim, HIDDEN)), bb=jnp.zeros((HIDDEN,), jnp.float32),
        we=_orth(next(it), (emb_dim, HIDDEN)), be=jnp.zeros((HIDDEN,), jnp.float32),
        wmod=jnp.stack([jnp.stack([_orth(next(it), (HIDDEN, HIDDEN))
                                   for _ in range(N_MODULES)])
                        for _ in range(N_LAYERS)]),                  # (L, M, H, H)
        bmod=jnp.zeros((N_LAYERS, N_MODULES, HIDDEN), jnp.float32),
        wrt=jnp.stack([_orth(next(it), (HIDDEN, N_MODULES))
                       for _ in range(N_LAYERS)]),                   # (L, H, M)
        brt=jnp.zeros((N_LAYERS, N_MODULES), jnp.float32),
        wo=_orth(next(it), (HIDDEN, out_dim)),
        bo=jnp.zeros((out_dim,), jnp.float32),
    )


def _init_dueling_q(key):
    k_sm, k_v, k_a1, k_a2 = jax.random.split(key, 4)
    p = _init_softmodule(k_sm, O_DIM, EMB_DIM, HIDDEN)
    p.update(wv=_orth(k_v, (HIDDEN, 1)), bv=jnp.zeros((1,), jnp.float32),
             wa1=_orth(k_a1, (HIDDEN, HIDDEN)), ba1=jnp.zeros((HIDDEN,), jnp.float32),
             wa2=_orth(k_a2, (HIDDEN, A_DIM)), ba2=jnp.zeros((A_DIM,), jnp.float32))
    return p


def init_discrete_sac(key):
    keys = jax.random.split(key, N_CRITIC + 1)
    return dict(q_nets=[_init_dueling_q(keys[i]) for i in range(N_CRITIC)],
                p_net=_init_softmodule(keys[-1], O_DIM, EMB_DIM, A_DIM))


# --------------------------------- parameter packing ---------------------------------------
def _pack_softmodule_slab(sm, out_dim):
    """Pack one soft-modularization block into the common (SLAB_ROWS, SLAB_COLS) slab
    and (BIAS_LEN,) bias vector (unused segments stay zero)."""
    in_dim, emb_dim = sm["wb"].shape[0], sm["we"].shape[0]
    slab = jnp.zeros((SLAB_ROWS, SLAB_COLS), jnp.float32)
    # block-diagonal fused input weight: [o | zc | pad] @ w_in = [base_pre | emb_pre]
    slab = slab.at[W_IN_R0:W_IN_R0 + in_dim, 0:HIDDEN].set(sm["wb"])
    slab = slab.at[W_IN_R0 + in_dim:W_IN_R0 + in_dim + emb_dim,
                   HIDDEN:2 * HIDDEN].set(sm["we"])
    # (L, M, H_in, H_out) -> (L*H_in, M*H_out): one wide matmul per layer covers all modules
    wmod = jnp.transpose(sm["wmod"], (0, 2, 1, 3)).reshape(
        N_LAYERS * HIDDEN, N_MODULES * HIDDEN)
    slab = slab.at[WMOD_R0:WMOD_R0 + N_LAYERS * HIDDEN, :].set(wmod)
    # (L, H, M) -> (H, L*M): all routing logits in one matmul
    wrt = jnp.transpose(sm["wrt"], (1, 0, 2)).reshape(HIDDEN, N_LAYERS * N_MODULES)
    slab = slab.at[TAIL_R0:TAIL_R0 + HIDDEN, WRT_COL:WRT_COL + N_LAYERS * N_MODULES].set(wrt)
    slab = slab.at[TAIL_R0:TAIL_R0 + HIDDEN, WO_COL:WO_COL + out_dim].set(sm["wo"])

    bias = jnp.zeros((BIAS_LEN,), jnp.float32)
    bias = bias.at[B_IN_OFF:B_IN_OFF + 2 * HIDDEN].set(
        jnp.concatenate([sm["bb"], sm["be"]]))
    bias = bias.at[B_MOD_OFF:B_MOD_OFF + N_LAYERS * N_MODULES * HIDDEN].set(
        sm["bmod"].reshape(-1))
    bias = bias.at[B_RT_OFF:B_RT_OFF + N_LAYERS * N_MODULES].set(sm["brt"].reshape(-1))
    bias = bias.at[B_OUT_OFF:B_OUT_OFF + out_dim].set(sm["bo"])
    return slab, bias


def _pack_qnet_slab(qp):
    slab, bias = _pack_softmodule_slab(qp, HIDDEN)
    slab = slab.at[TAIL_R0:TAIL_R0 + HIDDEN, HEAD1_COL:HEAD1_COL + HIDDEN].set(qp["wa1"])
    slab = slab.at[TAIL_R0:TAIL_R0 + HIDDEN,
                   HEAD1_COL + HIDDEN:HEAD1_COL + HIDDEN + 1].set(qp["wv"])
    slab = slab.at[TAIL_R0:TAIL_R0 + HIDDEN, WA2_COL:WA2_COL + A_DIM].set(qp["wa2"])
    bias = bias.at[B_HEAD1_OFF:B_HEAD1_OFF + HIDDEN].set(qp["ba1"])
    bias = bias.at[B_HEAD1_OFF + HIDDEN:B_HEAD1_OFF + HIDDEN + 1].set(qp["bv"])
    bias = bias.at[B_A2_OFF:B_A2_OFF + A_DIM].set(qp["ba2"])
    return slab, bias


def pack_params(params):
    slabs, biases = [], []
    for q in params["q_nets"]:
        s, b = _pack_qnet_slab(q)
        slabs.append(s)
        biases.append(b)
    s, b = _pack_softmodule_slab(params["p_net"], A_DIM)   # policy net is the last grid step
    slabs.append(s)
    biases.append(b)
    return dict(slabs=jnp.stack(slabs).astype(jnp.bfloat16),          # (N, 704, 512) bf16
                biases=jnp.stack(biases)[:, None, :])                 # (N, 1, 2944)  f32


# ------------------------------------------ main -------------------------------------------
if __name__ == "__main__":
    key = jax.random.PRNGKey(0)
    k_o, k_z, k_c, k_p = jax.random.split(key, 4)

    o = jax.random.normal(k_o, (BATCH, O_DIM), jnp.float32)
    z_map = jax.random.normal(k_z, (BATCH, Z_MAP_DIM), jnp.float32)
    collision_prob = jax.random.uniform(k_c, (BATCH, 1), jnp.float32)

    params = init_discrete_sac(k_p)
    packed = pack_params(params)

    fwd = jax.jit(discrete_sac_forward)
    Q, P = fwd(packed, o, z_map, collision_prob)
    jax.block_until_ready((Q, P))

    assert Q.shape == (BATCH, A_DIM) and P.shape == (BATCH, A_DIM)
    assert bool(jnp.all(jnp.isfinite(Q))) and bool(jnp.all(jnp.isfinite(P)))
    # policy rows must sum to 1 (softmax)
    assert bool(jnp.allclose(jnp.sum(P, axis=-1), 1.0, atol=1e-5))
    print("KERNEL_OK")
</pallas_src>

<mosaic_0001>
module attributes {stable_mosaic.version = 11 : i64} {
  func.func @kernel(%arg0: i32, %arg1: memref<16x64xf32, #tpu.memory_space<vmem>>, %arg2: memref<1x704x512xbf16, #tpu.memory_space<vmem>>, %arg3: memref<1x1x2944xf32, #tpu.memory_space<vmem>>, %arg4: memref<16x128xf32, #tpu.memory_space<vmem>>) attributes {dimension_semantics = [#tpu.dimension_semantics<arbitrary>], iteration_bounds = array<i64: 2>, scalar_prefetch = 0 : i64, scratch_operands = 0 : i64, tpu.core_type = #tpu.core_type<tc>, window_params = [{pipeline_mode = #tpu.pipeline_mode<synchronous>, transform_indices = @transform_0, window_bounds = array<i64: 16, 64>}, {transform_indices = @transform_1, window_bounds = array<i64: 1, 704, 512>}, {transform_indices = @transform_2, window_bounds = array<i64: 1, 1, 2944>}, {pipeline_mode = #tpu.pipeline_mode<synchronous>, transform_indices = @transform_3, window_bounds = array<i64: 16, 128>}]} {
    %c0 = arith.constant 0 : index
    %c0_0 = arith.constant 0 : index
    %0 = vector.load %arg1[%c0, %c0_0] : memref<16x64xf32, #tpu.memory_space<vmem>>, vector<16x64xf32>
    %c0_1 = arith.constant 0 : index
    %c0_2 = arith.constant 0 : index
    %c0_3 = arith.constant 0 : index
    %1 = vector.load %arg2[%c0_1, %c0_2, %c0_3] : memref<1x704x512xbf16, #tpu.memory_space<vmem>>, vector<1x64x256xbf16>
    %2 = vector.shape_cast %1 : vector<1x64x256xbf16> to vector<64x256xbf16>
    %3 = arith.truncf %0 : vector<16x64xf32> to vector<16x64xbf16>
    %cst = arith.constant dense<0.000000e+00> : vector<16x256xf32>
    %4 = tpu.matmul %3, %2, %cst {dimension_numbers = #tpu.dot_dimension_numbers<[1], [0], [0], [1], [0, 0, 1, 1], [], []>} : vector<16x64xbf16>, vector<64x256xbf16>, vector<16x256xf32> -> vector<16x256xf32>
    %c0_4 = arith.constant 0 : index
    %c0_5 = arith.constant 0 : index
    %c0_6 = arith.constant 0 : index
    %5 = vector.load %arg3[%c0_4, %c0_5, %c0_6] : memref<1x1x2944xf32, #tpu.memory_space<vmem>>, vector<1x1x256xf32>
    %6 = vector.shape_cast %5 : vector<1x1x256xf32> to vector<1x256xf32>
    %7 = vector.broadcast %6 : vector<1x256xf32> to vector<16x256xf32>
    %8 = arith.addf %4, %7 : vector<16x256xf32>
    %cst_7 = arith.constant 0.000000e+00 : f32
    %9 = vector.broadcast %cst_7 : f32 to vector<16x256xf32>
    %10 = arith.maximumf %8, %9 : vector<16x256xf32>
    %11 = vector.extract_strided_slice %10 {offsets = [0, 0], sizes = [16, 128], strides = [1, 1]} : vector<16x256xf32> to vector<16x128xf32>
    %12 = vector.extract_strided_slice %10 {offsets = [0, 128], sizes = [16, 128], strides = [1, 1]} : vector<16x256xf32> to vector<16x128xf32>
    %c0_8 = arith.constant 0 : index
    %c576 = arith.constant 576 : index
    %c0_9 = arith.constant 0 : index
    %13 = vector.load %arg2[%c0_8, %c576, %c0_9] : memref<1x704x512xbf16, #tpu.memory_space<vmem>>, vector<1x128x16xbf16>
    %14 = vector.shape_cast %13 : vector<1x128x16xbf16> to vector<128x16xbf16>
    %15 = arith.truncf %12 : vector<16x128xf32> to vector<16x128xbf16>
    %cst_10 = arith.constant dense<0.000000e+00> : vector<16x16xf32>
    %16 = tpu.matmul %15, %14, %cst_10 {dimension_numbers = #tpu.dot_dimension_numbers<[1], [0], [0], [1], [0, 0, 1, 1], [], []>} : vector<16x128xbf16>, vector<128x16xbf16>, vector<16x16xf32> -> vector<16x16xf32>
    %c0_11 = arith.constant 0 : index
    %c0_12 = arith.constant 0 : index
    %c2304 = arith.constant 2304 : index
    %17 = vector.load %arg3[%c0_11, %c0_12, %c2304] : memref<1x1x2944xf32, #tpu.memory_space<vmem>>, vector<1x1x16xf32>
    %18 = vector.shape_cast %17 : vector<1x1x16xf32> to vector<1x16xf32>
    %19 = vector.broadcast %18 : vector<1x16xf32> to vector<16x16xf32>
    %20 = arith.addf %16, %19 : vector<16x16xf32>
    %21 = vector.extract_strided_slice %20 {offsets = [0, 0], sizes = [16, 4], strides = [1, 1]} : vector<16x16xf32> to vector<16x4xf32>
    %cst_13 = arith.constant dense<0xFF800000> : vector<16xf32>
    %22 = vector.multi_reduction <maximumf>, %21, %cst_13 [1] : vector<16x4xf32> to vector<16xf32>
    %cst_14 = arith.constant 0xFF800000 : f32
    %23 = vector.broadcast %cst_14 : f32 to vector<16xf32>
    %24 = arith.maximumf %23, %22 : vector<16xf32>
    %25 = vector.shape_cast %24 : vector<16xf32> to vector<16x1xf32>
    %26 = vector.broadcast %25 : vector<16x1xf32> to vector<16x4xf32>
    %27 = arith.subf %21, %26 : vector<16x4xf32>
    %28 = math.exp %27 : vector<16x4xf32>
    %cst_15 = arith.constant dense<0.000000e+00> : vector<16xf32>
    %29 = vector.multi_reduction <add>, %28, %cst_15 [1] : vector<16x4xf32> to vector<16xf32>
    %30 = vector.shape_cast %29 : vector<16xf32> to vector<16x1xf32>
    %31 = vector.broadcast %30 : vector<16x1xf32> to vector<16x4xf32>
    %32 = arith.divf %28, %31 : vector<16x4xf32>
    %33 = vector.extract_strided_slice %20 {offsets = [0, 4], sizes = [16, 4], strides = [1, 1]} : vector<16x16xf32> to vector<16x4xf32>
    %cst_16 = arith.constant dense<0xFF800000> : vector<16xf32>
    %34 = vector.multi_reduction <maximumf>, %33, %cst_16 [1] : vector<16x4xf32> to vector<16xf32>
    %cst_17 = arith.constant 0xFF800000 : f32
    %35 = vector.broadcast %cst_17 : f32 to vector<16xf32>
    %36 = arith.maximumf %35, %34 : vector<16xf32>
    %37 = vector.shape_cast %36 : vector<16xf32> to vector<16x1xf32>
    %38 = vector.broadcast %37 : vector<16x1xf32> to vector<16x4xf32>
    %39 = arith.subf %33, %38 : vector<16x4xf32>
    %40 = math.exp %39 : vector<16x4xf32>
    %cst_18 = arith.constant dense<0.000000e+00> : vector<16xf32>
    %41 = vector.multi_reduction <add>, %40, %cst_18 [1] : vector<16x4xf32> to vector<16xf32>
    %42 = vector.shape_cast %41 : vector<16xf32> to vector<16x1xf32>
    %43 = vector.broadcast %42 : vector<16x1xf32> to vector<16x4xf32>
    %44 = arith.divf %40, %43 : vector<16x4xf32>
    %45 = vector.extract_strided_slice %20 {offsets = [0, 8], sizes = [16, 4], strides = [1, 1]} : vector<16x16xf32> to vector<16x4xf32>
    %cst_19 = arith.constant dense<0xFF800000> : vector<16xf32>
    %46 = vector.multi_reduction <maximumf>, %45, %cst_19 [1] : vector<16x4xf32> to vector<16xf32>
    %cst_20 = arith.constant 0xFF800000 : f32
    %47 = vector.broadcast %cst_20 : f32 to vector<16xf32>
    %48 = arith.maximumf %47, %46 : vector<16xf32>
    %49 = vector.shape_cast %48 : vector<16xf32> to vector<16x1xf32>
    %50 = vector.broadcast %49 : vector<16x1xf32> to vector<16x4xf32>
    %51 = arith.subf %45, %50 : vector<16x4xf32>
    %52 = math.exp %51 : vector<16x4xf32>
    %cst_21 = arith.constant dense<0.000000e+00> : vector<16xf32>
    %53 = vector.multi_reduction <add>, %52, %cst_21 [1] : vector<16x4xf32> to vector<16xf32>
    %54 = vector.shape_cast %53 : vector<16xf32> to vector<16x1xf32>
    %55 = vector.broadcast %54 : vector<16x1xf32> to vector<16x4xf32>
    %56 = arith.divf %52, %55 : vector<16x4xf32>
    %57 = vector.extract_strided_slice %20 {offsets = [0, 12], sizes = [16, 4], strides = [1, 1]} : vector<16x16xf32> to vector<16x4xf32>
    %cst_22 = arith.constant dense<0xFF800000> : vector<16xf32>
    %58 = vector.multi_reduction <maximumf>, %57, %cst_22 [1] : vector<16x4xf32> to vector<16xf32>
    %cst_23 = arith.constant 0xFF800000 : f32
    %59 = vector.broadcast %cst_23 : f32 to vector<16xf32>
    %60 = arith.maximumf %59, %58 : vector<16xf32>
    %61 = vector.shape_cast %60 : vector<16xf32> to vector<16x1xf32>
    %62 = vector.broadcast %61 : vector<16x1xf32> to vector<16x4xf32>
    %63 = arith.subf %57, %62 : vector<16x4xf32>
    %64 = math.exp %63 : vector<16x4xf32>
    %cst_24 = arith.constant dense<0.000000e+00> : vector<16xf32>
    %65 = vector.multi_reduction <add>, %64, %cst_24 [1] : vector<16x4xf32> to vector<16xf32>
    %66 = vector.shape_cast %65 : vector<16xf32> to vector<16x1xf32>
    %67 = vector.broadcast %66 : vector<16x1xf32> to vector<16x4xf32>
    %68 = arith.divf %64, %67 : vector<16x4xf32>
    %c0_25 = arith.constant 0 : index
    %c64 = arith.constant 64 : index
    %c0_26 = arith.constant 0 : index
    %69 = vector.load %arg2[%c0_25, %c64, %c0_26] : memref<1x704x512xbf16, #tpu.memory_space<vmem>>, vector<1x128x512xbf16>
    %70 = vector.shape_cast %69 : vector<1x128x512xbf16> to vector<128x512xbf16>
    %c0_27 = arith.constant 0 : index
    %c0_28 = arith.constant 0 : index
    %c256 = arith.constant 256 : index
    %71 = vector.load %arg3[%c0_27, %c0_28, %c256] : memref<1x1x2944xf32, #tpu.memory_space<vmem>>, vector<1x1x512xf32>
    %72 = vector.shape_cast %71 : vector<1x1x512xf32> to vector<1x512xf32>
    %73 = arith.truncf %11 : vector<16x128xf32> to vector<16x128xbf16>
    %cst_29 = arith.constant dense<0.000000e+00> : vector<16x512xf32>
    %74 = tpu.matmul %73, %70, %cst_29 {dimension_numbers = #tpu.dot_dimension_numbers<[1], [0], [0], [1], [0, 0, 1, 1], [], []>} : vector<16x128xbf16>, vector<128x512xbf16>, vector<16x512xf32> -> vector<16x512xf32>
    %75 = vector.broadcast %72 : vector<1x512xf32> to vector<16x512xf32>
    %76 = arith.addf %74, %75 : vector<16x512xf32>
    %cst_30 = arith.constant 0.000000e+00 : f32
    %77 = vector.broadcast %cst_30 : f32 to vector<16x512xf32>
    %78 = arith.maximumf %76, %77 : vector<16x512xf32>
    %79 = vector.extract_strided_slice %32 {offsets = [0, 0], sizes = [16, 1], strides = [1, 1]} : vector<16x4xf32> to vector<16x1xf32>
    %80 = vector.extract_strided_slice %78 {offsets = [0, 0], sizes = [16, 128], strides = [1, 1]} : vector<16x512xf32> to vector<16x128xf32>
    %81 = vector.broadcast %79 : vector<16x1xf32> to vector<16x128xf32>
    %82 = arith.mulf %81, %80 : vector<16x128xf32>
    %83 = vector.extract_strided_slice %32 {offsets = [0, 1], sizes = [16, 1], strides = [1, 1]} : vector<16x4xf32> to vector<16x1xf32>
    %84 = vector.extract_strided_slice %78 {offsets = [0, 128], sizes = [16, 128], strides = [1, 1]} : vector<16x512xf32> to vector<16x128xf32>
    %85 = vector.broadcast %83 : vector<16x1xf32> to vector<16x128xf32>
    %86 = arith.mulf %85, %84 : vector<16x128xf32>
    %87 = arith.addf %82, %86 : vector<16x128xf32>
    %88 = vector.extract_strided_slice %32 {offsets = [0, 2], sizes = [16, 1], strides = [1, 1]} : vector<16x4xf32> to vector<16x1xf32>
    %89 = vector.extract_strided_slice %78 {offsets = [0, 256], sizes = [16, 128], strides = [1, 1]} : vector<16x512xf32> to vector<16x128xf32>
    %90 = vector.broadcast %88 : vector<16x1xf32> to vector<16x128xf32>
    %91 = arith.mulf %90, %89 : vector<16x128xf32>
    %92 = arith.addf %87, %91 : vector<16x128xf32>
    %93 = vector.extract_strided_slice %32 {offsets = [0, 3], sizes = [16, 1], strides = [1, 1]} : vector<16x4xf32> to vector<16x1xf32>
    %94 = vector.extract_strided_slice %78 {offsets = [0, 384], sizes = [16, 128], strides = [1, 1]} : vector<16x512xf32> to vector<16x128xf32>
    %95 = vector.broadcast %93 : vector<16x1xf32> to vector<16x128xf32>
    %96 = arith.mulf %95, %94 : vector<16x128xf32>
    %97 = arith.addf %92, %96 : vector<16x128xf32>
    %c0_31 = arith.constant 0 : index
    %c192 = arith.constant 192 : index
    %c0_32 = arith.constant 0 : index
    %98 = vector.load %arg2[%c0_31, %c192, %c0_32] : memref<1x704x512xbf16, #tpu.memory_space<vmem>>, vector<1x128x512xbf16>
    %99 = vector.shape_cast %98 : vector<1x128x512xbf16> to vector<128x512xbf16>
    %c0_33 = arith.constant 0 : index
    %c0_34 = arith.constant 0 : index
    %c768 = arith.constant 768 : index
    %100 = vector.load %arg3[%c0_33, %c0_34, %c768] : memref<1x1x2944xf32, #tpu.memory_space<vmem>>, vector<1x1x512xf32>
    %101 = vector.shape_cast %100 : vector<1x1x512xf32> to vector<1x512xf32>
    %102 = arith.truncf %97 : vector<16x128xf32> to vector<16x128xbf16>
    %cst_35 = arith.constant dense<0.000000e+00> : vector<16x512xf32>
    %103 = tpu.matmul %102, %99, %cst_35 {dimension_numbers = #tpu.dot_dimension_numbers<[1], [0], [0], [1], [0, 0, 1, 1], [], []>} : vector<16x128xbf16>, vector<128x512xbf16>, vector<16x512xf32> -> vector<16x512xf32>
    %104 = vector.broadcast %101 : vector<1x512xf32> to vector<16x512xf32>
    %105 = arith.addf %103, %104 : vector<16x512xf32>
    %cst_36 = arith.constant 0.000000e+00 : f32
    %106 = vector.broadcast %cst_36 : f32 to vector<16x512xf32>
    %107 = arith.maximumf %105, %106 : vector<16x512xf32>
    %108 = vector.extract_strided_slice %44 {offsets = [0, 0], sizes = [16, 1], strides = [1, 1]} : vector<16x4xf32> to vector<16x1xf32>
    %109 = vector.extract_strided_slice %107 {offsets = [0, 0], sizes = [16, 128], strides = [1, 1]} : vector<16x512xf32> to vector<16x128xf32>
    %110 = vector.broadcast %108 : vector<16x1xf32> to vector<16x128xf32>
    %111 = arith.mulf %110, %109 : vector<16x128xf32>
    %112 = vector.extract_strided_slice %44 {offsets = [0, 1], sizes = [16, 1], strides = [1, 1]} : vector<16x4xf32> to vector<16x1xf32>
    %113 = vector.extract_strided_slice %107 {offsets = [0, 128], sizes = [16, 128], strides = [1, 1]} : vector<16x512xf32> to vector<16x128xf32>
    %114 = vector.broadcast %112 : vector<16x1xf32> to vector<16x128xf32>
    %115 = arith.mulf %114, %113 : vector<16x128xf32>
    %116 = arith.addf %111, %115 : vector<16x128xf32>
    %117 = vector.extract_strided_slice %44 {offsets = [0, 2], sizes = [16, 1], strides = [1, 1]} : vector<16x4xf32> to vector<16x1xf32>
    %118 = vector.extract_strided_slice %107 {offsets = [0, 256], sizes = [16, 128], strides = [1, 1]} : vector<16x512xf32> to vector<16x128xf32>
    %119 = vector.broadcast %117 : vector<16x1xf32> to vector<16x128xf32>
    %120 = arith.mulf %119, %118 : vector<16x128xf32>
    %121 = arith.addf %116, %120 : vector<16x128xf32>
    %122 = vector.extract_strided_slice %44 {offsets = [0, 3], sizes = [16, 1], strides = [1, 1]} : vector<16x4xf32> to vector<16x1xf32>
    %123 = vector.extract_strided_slice %107 {offsets = [0, 384], sizes = [16, 128], strides = [1, 1]} : vector<16x512xf32> to vector<16x128xf32>
    %124 = vector.broadcast %122 : vector<16x1xf32> to vector<16x128xf32>
    %125 = arith.mulf %124, %123 : vector<16x128xf32>
    %126 = arith.addf %121, %125 : vector<16x128xf32>
    %c0_37 = arith.constant 0 : index
    %c320 = arith.constant 320 : index
    %c0_38 = arith.constant 0 : index
    %127 = vector.load %arg2[%c0_37, %c320, %c0_38] : memref<1x704x512xbf16, #tpu.memory_space<vmem>>, vector<1x128x512xbf16>
    %128 = vector.shape_cast %127 : vector<1x128x512xbf16> to vector<128x512xbf16>
    %c0_39 = arith.constant 0 : index
    %c0_40 = arith.constant 0 : index
    %c1280 = arith.constant 1280 : index
    %129 = vector.load %arg3[%c0_39, %c0_40, %c1280] : memref<1x1x2944xf32, #tpu.memory_space<vmem>>, vector<1x1x512xf32>
    %130 = vector.shape_cast %129 : vector<1x1x512xf32> to vector<1x512xf32>
    %131 = arith.truncf %126 : vector<16x128xf32> to vector<16x128xbf16>
    %cst_41 = arith.constant dense<0.000000e+00> : vector<16x512xf32>
    %132 = tpu.matmul %131, %128, %cst_41 {dimension_numbers = #tpu.dot_dimension_numbers<[1], [0], [0], [1], [0, 0, 1, 1], [], []>} : vector<16x128xbf16>, vector<128x512xbf16>, vector<16x512xf32> -> vector<16x512xf32>
    %133 = vector.broadcast %130 : vector<1x512xf32> to vector<16x512xf32>
    %134 = arith.addf %132, %133 : vector<16x512xf32>
    %cst_42 = arith.constant 0.000000e+00 : f32
    %135 = vector.broadcast %cst_42 : f32 to vector<16x512xf32>
    %136 = arith.maximumf %134, %135 : vector<16x512xf32>
    %137 = vector.extract_strided_slice %56 {offsets = [0, 0], sizes = [16, 1], strides = [1, 1]} : vector<16x4xf32> to vector<16x1xf32>
    %138 = vector.extract_strided_slice %136 {offsets = [0, 0], sizes = [16, 128], strides = [1, 1]} : vector<16x512xf32> to vector<16x128xf32>
    %139 = vector.broadcast %137 : vector<16x1xf32> to vector<16x128xf32>
    %140 = arith.mulf %139, %138 : vector<16x128xf32>
    %141 = vector.extract_strided_slice %56 {offsets = [0, 1], sizes = [16, 1], strides = [1, 1]} : vector<16x4xf32> to vector<16x1xf32>
    %142 = vector.extract_strided_slice %136 {offsets = [0, 128], sizes = [16, 128], strides = [1, 1]} : vector<16x512xf32> to vector<16x128xf32>
    %143 = vector.broadcast %141 : vector<16x1xf32> to vector<16x128xf32>
    %144 = arith.mulf %143, %142 : vector<16x128xf32>
    %145 = arith.addf %140, %144 : vector<16x128xf32>
    %146 = vector.extract_strided_slice %56 {offsets = [0, 2], sizes = [16, 1], strides = [1, 1]} : vector<16x4xf32> to vector<16x1xf32>
    %147 = vector.extract_strided_slice %136 {offsets = [0, 256], sizes = [16, 128], strides = [1, 1]} : vector<16x512xf32> to vector<16x128xf32>
    %148 = vector.broadcast %146 : vector<16x1xf32> to vector<16x128xf32>
    %149 = arith.mulf %148, %147 : vector<16x128xf32>
    %150 = arith.addf %145, %149 : vector<16x128xf32>
    %151 = vector.extract_strided_slice %56 {offsets = [0, 3], sizes = [16, 1], strides = [1, 1]} : vector<16x4xf32> to vector<16x1xf32>
    %152 = vector.extract_strided_slice %136 {offsets = [0, 384], sizes = [16, 128], strides = [1, 1]} : vector<16x512xf32> to vector<16x128xf32>
    %153 = vector.broadcast %151 : vector<16x1xf32> to vector<16x128xf32>
    %154 = arith.mulf %153, %152 : vector<16x128xf32>
    %155 = arith.addf %150, %154 : vector<16x128xf32>
    %c0_43 = arith.constant 0 : index
    %c448 = arith.constant 448 : index
    %c0_44 = arith.constant 0 : index
    %156 = vector.load %arg2[%c0_43, %c448, %c0_44] : memref<1x704x512xbf16, #tpu.memory_space<vmem>>, vector<1x128x512xbf16>
    %157 = vector.shape_cast %156 : vector<1x128x512xbf16> to vector<128x512xbf16>
    %c0_45 = arith.constant 0 : index
    %c0_46 = arith.constant 0 : index
    %c1792 = arith.constant 1792 : index
    %158 = vector.load %arg3[%c0_45, %c0_46, %c1792] : memref<1x1x2944xf32, #tpu.memory_space<vmem>>, vector<1x1x512xf32>
    %159 = vector.shape_cast %158 : vector<1x1x512xf32> to vector<1x512xf32>
    %160 = arith.truncf %155 : vector<16x128xf32> to vector<16x128xbf16>
    %cst_47 = arith.constant dense<0.000000e+00> : vector<16x512xf32>
    %161 = tpu.matmul %160, %157, %cst_47 {dimension_numbers = #tpu.dot_dimension_numbers<[1], [0], [0], [1], [0, 0, 1, 1], [], []>} : vector<16x128xbf16>, vector<128x512xbf16>, vector<16x512xf32> -> vector<16x512xf32>
    %162 = vector.broadcast %159 : vector<1x512xf32> to vector<16x512xf32>
    %163 = arith.addf %161, %162 : vector<16x512xf32>
    %cst_48 = arith.constant 0.000000e+00 : f32
    %164 = vector.broadcast %cst_48 : f32 to vector<16x512xf32>
    %165 = arith.maximumf %163, %164 : vector<16x512xf32>
    %166 = vector.extract_strided_slice %68 {offsets = [0, 0], sizes = [16, 1], strides = [1, 1]} : vector<16x4xf32> to vector<16x1xf32>
    %167 = vector.extract_strided_slice %165 {offsets = [0, 0], sizes = [16, 128], strides = [1, 1]} : vector<16x512xf32> to vector<16x128xf32>
    %168 = vector.broadcast %166 : vector<16x1xf32> to vector<16x128xf32>
    %169 = arith.mulf %168, %167 : vector<16x128xf32>
    %170 = vector.extract_strided_slice %68 {offsets = [0, 1], sizes = [16, 1], strides = [1, 1]} : vector<16x4xf32> to vector<16x1xf32>
    %171 = vector.extract_strided_slice %165 {offsets = [0, 128], sizes = [16, 128], strides = [1, 1]} : vector<16x512xf32> to vector<16x128xf32>
    %172 = vector.broadcast %170 : vector<16x1xf32> to vector<16x128xf32>
    %173 = arith.mulf %172, %171 : vector<16x128xf32>
    %174 = arith.addf %169, %173 : vector<16x128xf32>
    %175 = vector.extract_strided_slice %68 {offsets = [0, 2], sizes = [16, 1], strides = [1, 1]} : vector<16x4xf32> to vector<16x1xf32>
    %176 = vector.extract_strided_slice %165 {offsets = [0, 256], sizes = [16, 128], strides = [1, 1]} : vector<16x512xf32> to vector<16x128xf32>
    %177 = vector.broadcast %175 : vector<16x1xf32> to vector<16x128xf32>
    %178 = arith.mulf %177, %176 : vector<16x128xf32>
    %179 = arith.addf %174, %178 : vector<16x128xf32>
    %180 = vector.extract_strided_slice %68 {offsets = [0, 3], sizes = [16, 1], strides = [1, 1]} : vector<16x4xf32> to vector<16x1xf32>
    %181 = vector.extract_strided_slice %165 {offsets = [0, 384], sizes = [16, 128], strides = [1, 1]} : vector<16x512xf32> to vector<16x128xf32>
    %182 = vector.broadcast %180 : vector<16x1xf32> to vector<16x128xf32>
    %183 = arith.mulf %182, %181 : vector<16x128xf32>
    %184 = arith.addf %179, %183 : vector<16x128xf32>
    %c0_49 = arith.constant 0 : index
    %c576_50 = arith.constant 576 : index
    %c128 = arith.constant 128 : index
    %185 = vector.load %arg2[%c0_49, %c576_50, %c128] : memref<1x704x512xbf16, #tpu.memory_space<vmem>>, vector<1x128x128xbf16>
    %186 = vector.shape_cast %185 : vector<1x128x128xbf16> to vector<128x128xbf16>
    %187 = arith.truncf %184 : vector<16x128xf32> to vector<16x128xbf16>
    %cst_51 = arith.constant dense<0.000000e+00> : vector<16x128xf32>
    %188 = tpu.matmul %187, %186, %cst_51 {dimension_numbers = #tpu.dot_dimension_numbers<[1], [0], [0], [1], [0, 0, 1, 1], [], []>} : vector<16x128xbf16>, vector<128x128xbf16>, vector<16x128xf32> -> vector<16x128xf32>
    %c0_52 = arith.constant 0 : index
    %c0_53 = arith.constant 0 : index
    %c2432 = arith.constant 2432 : index
    %189 = vector.load %arg3[%c0_52, %c0_53, %c2432] : memref<1x1x2944xf32, #tpu.memory_space<vmem>>, vector<1x1x128xf32>
    %190 = vector.shape_cast %189 : vector<1x1x128xf32> to vector<1x128xf32>
    %191 = vector.broadcast %190 : vector<1x128xf32> to vector<16x128xf32>
    %192 = arith.addf %188, %191 : vector<16x128xf32>
    %c0_i32 = arith.constant 0 : i32
    %193 = arith.cmpi eq, %arg0, %c0_i32 : i32
    %194 = arith.extui %193 : i1 to i32
    %c0_i32_54 = arith.constant 0 : i32
    %195 = arith.cmpi ne, %194, %c0_i32_54 : i32
    scf.if %195 {
      %cst_58 = arith.constant 0.000000e+00 : f32
      %202 = vector.broadcast %cst_58 : f32 to vector<16x128xf32>
      %c0_59 = arith.constant 0 : index
      %c0_60 = arith.constant 0 : index
      %203 = vector.load %arg4[%c0_59, %c0_60] : memref<16x128xf32, #tpu.memory_space<vmem>>, vector<16x128xf32>
      tpu.vector_store %arg4[%c0_59, %c0_60], %202 {strides = array<i32>} : memref<16x128xf32, #tpu.memory_space<vmem>>, vector<16x128xf32>,
    } else {
    }
    %c1_i32 = arith.constant 1 : i32
    %196 = arith.cmpi slt, %arg0, %c1_i32 : i32
    %197 = arith.extui %196 : i1 to i32
    %c0_i32_55 = arith.constant 0 : i32
    %198 = arith.cmpi ne, %197, %c0_i32_55 : i32
    scf.if %198 {
      %c0_58 = arith.constant 0 : index
      %c576_59 = arith.constant 576 : index
      %c256_60 = arith.constant 256 : index
      %202 = vector.load %arg2[%c0_58, %c576_59, %c256_60] : memref<1x704x512xbf16, #tpu.memory_space<vmem>>, vector<1x128x129xbf16>
      %203 = vector.shape_cast %202 : vector<1x128x129xbf16> to vector<128x129xbf16>
      %204 = arith.truncf %192 : vector<16x128xf32> to vector<16x128xbf16>
      %cst_61 = arith.constant dense<0.000000e+00> : vector<16x129xf32>
      %205 = tpu.matmul %204, %203, %cst_61 {dimension_numbers = #tpu.dot_dimension_numbers<[1], [0], [0], [1], [0, 0, 1, 1], [], []>} : vector<16x128xbf16>, vector<128x129xbf16>, vector<16x129xf32> -> vector<16x129xf32>
      %c0_62 = arith.constant 0 : index
      %c0_63 = arith.constant 0 : index
      %c2560 = arith.constant 2560 : index
      %206 = vector.load %arg3[%c0_62, %c0_63, %c2560] : memref<1x1x2944xf32, #tpu.memory_space<vmem>>, vector<1x1x129xf32>
      %207 = vector.shape_cast %206 : vector<1x1x129xf32> to vector<1x129xf32>
      %208 = vector.broadcast %207 : vector<1x129xf32> to vector<16x129xf32>
      %209 = arith.addf %205, %208 : vector<16x129xf32>
      %210 = vector.extract_strided_slice %209 {offsets = [0, 0], sizes = [16, 128], strides = [1, 1]} : vector<16x129xf32> to vector<16x128xf32>
      %cst_64 = arith.constant 0.000000e+00 : f32
      %211 = vector.broadcast %cst_64 : f32 to vector<16x128xf32>
      %212 = arith.maximumf %210, %211 : vector<16x128xf32>
      %213 = vector.extract_strided_slice %209 {offsets = [0, 128], sizes = [16, 1], strides = [1, 1]} : vector<16x129xf32> to vector<16x1xf32>
      %c0_65 = arith.constant 0 : index
      %c576_66 = arith.constant 576 : index
      %c16 = arith.constant 16 : index
      %214 = vector.load %arg2[%c0_65, %c576_66, %c16] : memref<1x704x512xbf16, #tpu.memory_space<vmem>>, vector<1x128x8xbf16>
      %215 = vector.shape_cast %214 : vector<1x128x8xbf16> to vector<128x8xbf16>
      %216 = arith.truncf %212 : vector<16x128xf32> to vector<16x128xbf16>
      %cst_67 = arith.constant dense<0.000000e+00> : vector<16x8xf32>
      %217 = tpu.matmul %216, %215, %cst_67 {dimension_numbers = #tpu.dot_dimension_numbers<[1], [0], [0], [1], [0, 0, 1, 1], [], []>} : vector<16x128xbf16>, vector<128x8xbf16>, vector<16x8xf32> -> vector<16x8xf32>
      %c0_68 = arith.constant 0 : index
      %c0_69 = arith.constant 0 : index
      %c2816 = arith.constant 2816 : index
      %218 = vector.load %arg3[%c0_68, %c0_69, %c2816] : memref<1x1x2944xf32, #tpu.memory_space<vmem>>, vector<1x1x8xf32>
      %219 = vector.shape_cast %218 : vector<1x1x8xf32> to vector<1x8xf32>
      %220 = vector.broadcast %219 : vector<1x8xf32> to vector<16x8xf32>
      %221 = arith.addf %217, %220 : vector<16x8xf32>
      %cst_70 = arith.constant dense<0.000000e+00> : vector<16xf32>
      %222 = vector.multi_reduction <add>, %221, %cst_70 [1] : vector<16x8xf32> to vector<16xf32>
      %223 = vector.shape_cast %222 : vector<16xf32> to vector<16x1xf32>
      %cst_71 = arith.constant 8.000000e+00 : f32
      %224 = vector.broadcast %cst_71 : f32 to vector<16x1xf32>
      %225 = arith.divf %223, %224 : vector<16x1xf32>
      %226 = vector.broadcast %225 : vector<16x1xf32> to vector<16x8xf32>
      %227 = arith.subf %221, %226 : vector<16x8xf32>
      %228 = vector.broadcast %213 : vector<16x1xf32> to vector<16x8xf32>
      %229 = arith.addf %227, %228 : vector<16x8xf32>
      %c0_72 = arith.constant 0 : index
      %c0_73 = arith.constant 0 : index
      %230 = vector.load %arg4[%c0_72, %c0_73] : memref<16x128xf32, #tpu.memory_space<vmem>>, vector<16x8xf32>
      %c0_i32_74 = arith.constant 0 : i32
      %231 = arith.cmpi eq, %arg0, %c0_i32_74 : i32
      %232 = arith.minimumf %230, %229 : vector<16x8xf32>
      %233 = arith.select %231, %229, %232 : vector<16x8xf32>
      %c0_75 = arith.constant 0 : index
      %c0_76 = arith.constant 0 : index
      %234 = vector.load %arg4[%c0_75, %c0_76] : memref<16x128xf32, #tpu.memory_space<vmem>>, vector<16x8xf32>
      tpu.vector_store %arg4[%c0_75, %c0_76], %233 {strides = array<i32>} : memref<16x128xf32, #tpu.memory_space<vmem>>, vector<16x8xf32>,
    } else {
    }
    %c1_i32_56 = arith.constant 1 : i32
    %199 = arith.cmpi eq, %arg0, %c1_i32_56 : i32
    %200 = arith.extui %199 : i1 to i32
    %c0_i32_57 = arith.constant 0 : i32
    %201 = arith.cmpi ne, %200, %c0_i32_57 : i32
    scf.if %201 {
      %202 = vector.extract_strided_slice %192 {offsets = [0, 0], sizes = [16, 8], strides = [1, 1]} : vector<16x128xf32> to vector<16x8xf32>
      %cst_58 = arith.constant dense<0xFF800000> : vector<16xf32>
      %203 = vector.multi_reduction <maximumf>, %202, %cst_58 [1] : vector<16x8xf32> to vector<16xf32>
      %cst_59 = arith.constant 0xFF800000 : f32
      %204 = vector.broadcast %cst_59 : f32 to vector<16xf32>
      %205 = arith.maximumf %204, %203 : vector<16xf32>
      %206 = vector.shape_cast %205 : vector<16xf32> to vector<16x1xf32>
      %207 = vector.broadcast %206 : vector<16x1xf32> to vector<16x8xf32>
      %208 = arith.subf %202, %207 : vector<16x8xf32>
      %209 = math.exp %208 : vector<16x8xf32>
      %cst_60 = arith.constant dense<0.000000e+00> : vector<16xf32>
      %210 = vector.multi_reduction <add>, %209, %cst_60 [1] : vector<16x8xf32> to vector<16xf32>
      %211 = vector.shape_cast %210 : vector<16xf32> to vector<16x1xf32>
      %212 = vector.broadcast %211 : vector<16x1xf32> to vector<16x8xf32>
      %213 = arith.divf %209, %212 : vector<16x8xf32>
      %c0_61 = arith.constant 0 : index
      %c8 = arith.constant 8 : index
      %214 = vector.load %arg4[%c0_61, %c8] : memref<16x128xf32, #tpu.memory_space<vmem>>, vector<16x8xf32>
      tpu.vector_store %arg4[%c0_61, %c8], %213 {strides = array<i32>} : memref<16x128xf32, #tpu.memory_space<vmem>>, vector<16x8xf32>,
    } else {
    }
    return
  }
  func.func @transform_0(%arg0: i32) -> (i32, i32) {
    %c0_i32 = arith.constant 0 : i32
    %c0_i32_0 = arith.constant 0 : i32
    %c0_i32_1 = arith.constant 0 : i32
    return %c0_i32, %c0_i32_0 : i32, i32
  }
  func.func @transform_1(%arg0: i32) -> (i32, i32, i32) {
    %c0_i32 = arith.constant 0 : i32
    %c0_i32_0 = arith.constant 0 : i32
    %c0_i32_1 = arith.constant 0 : i32
    return %arg0, %c0_i32, %c0_i32_0 : i32, i32, i32
  }
  func.func @transform_2(%arg0: i32) -> (i32, i32, i32) {
    %c0_i32 = arith.constant 0 : i32
    %c0_i32_0 = arith.constant 0 : i32
    %c0_i32_1 = arith.constant 0 : i32
    return %arg0, %c0_i32, %c0_i32_0 : i32, i32, i32
  }
  func.func @transform_3(%arg0: i32) -> (i32, i32) {
    %c0_i32 = arith.constant 0 : i32
    %c0_i32_0 = arith.constant 0 : i32
    %c0_i32_1 = arith.constant 0 : i32
    return %c0_i32, %c0_i32_0 : i32, i32
  }
}

</mosaic_0001>

<bundles_post_ra>
// kernel: discrete_sac_forward.1
= control target key start
LH: loop header
LB: loop body
LE: loop exit
PB: predicated region body
PF: predicated region fallthrough
CT: control target
= control target key end

     0   :  { %8 = vsyncpa [#allocation3], 0  ;;  %s3915_s0 = inlined_call_operand.vmem [shape: f32[16,64], index: 0, kind: input, shape index: {}]   ;;  %s3916_s1 = inlined_call_operand.hbm [shape: bf16[2,704,512], index: 1, kind: input, shape index: {}]   ;;  %s3917_s2 = inlined_call_operand.hbm [shape: f32[2,1,2944], index: 2, kind: input, shape index: {}]   ;;  %s3918_s3 = inlined_call_operand.vmem [shape: f32[16,128], index: 3, kind: output, shape index: {}]  }
   0x1   :  { %10 = vsyncpa [#allocation3 + $0x1], 0 }
   0x2   :  { %11 = vsyncpa [#allocation5], 0 }
   0x3   :  { %13 = vsyncpa [#allocation5 + $0x1], 0  ;;  %s3362_s12 = smov 0   ;;  %s3364_s13 = smov 0  }
   0x4   :  { %s3366_s14 = smov 0   ;;  %s3368_s15 = smov 0  }
   0x5 LB: > { %s3381_s16 = sadd.s32 4294967295, %s3309_s15   ;;  %s3384_s17 = sadd.s32 1, %s3309_s15   ;;  %s3309_s15 = sphi %s3368_s15, %s3931_s15   ;;  %s3305_s14 = sphi %s3366_s14, %s3930_s14   ;;  %s3301_s13 = sphi %s3364_s13, %s3929_s13   ;;  %s3297_s12 = sphi %s3362_s12, %s3928_s12  }
   0x6   : > { %s44_s18 = ssub.s32 %s3309_s15, %s3384_s17  ;;  %s47_s19 = sadd.s32 1, %s3305_s14 }
   0x7   : > { %p45_p0 = scmp.eq.s32.totalorder %s44_s18, 0  ;;  %p54_p1 = scmp.ne.s32.totalorder %s3305_s14, %s3301_s13 }
   0x8   : > { %p55_p2 = scmp.eq.s32.totalorder %s3309_s15, 0  ;;  %p60_p3 = scmp.ne.s32.totalorder %s3301_s13, %s3297_s12 }
   0x9   : > { %s3394_s20 = scalar_select %p45_p0, %s3305_s14, %s47_s19  }
   0xa   : > { %p56_p4 = por %p55_p2, %p54_p1  ;;  %p3919_p5 = scmp.eq.s32.totalorder %s3381_s16, 0 }
   0xb   : > { %p2822_p6 = scmp.lt.s32.totalorder %s3309_s15, 2  ;;  %s3405_s22 = sand.u32 1, %s3305_s14  }
   0xc   : > { %p3400_p7 = por %p3919_p5, %p60_p3  ;;  %s2805_s23 = smul.u32 1408, %s3405_s22 }
   0xd   : > { %s2806_s24 = smul.u32 22528, %s3309_s15  ;;  %p3409_p8 = pnand %p2822_p6, %p56_p4 }
   0xe   : > { %s3921_s21 = scalar_select %p3400_p7, 1, 0 }
   0xf   : > { %s3416_s28 = scalar_lea.hbm %s3916_s1, %s2806_s24  ;;  %s138_s29 = scalar_lea.vmem [#allocation2], %s2805_s23 }
  0x10   : > { %s145_s30 = sshll.u32 %s138_s29, 4  ;;  %s135_s4 = scalar_lea.sflag [#allocation3], %s3405_s22  ;;  %s3418_s30 = int_to_ptr.vmem [resolvable:$true] %s145_s30 }
  0x11   : > { %s3211_s5 = scalar_lea.hbm %s3416_s28, 22528  ;;  %p3213_p11 = pneg %p3409_p8 }
  0x12   : > { %p3212_p10 = scmp.ne.s32.totalorder %s3416_s28, %s3211_s5  ;;  %s3216_s8 = scalar_lea.hbm %s3916_s1, 45056 }
  0x13   : > { %p3217_p0 = scmp.lt.u32.totalorder %s3416_s28, %s3916_s1  ;;  %p3218_p1 = scmp.lt.u32.totalorder %s3216_s8, %s3211_s5 }
  0x14   : > { %p3214_p12 = pnand %p3213_p11, %p3212_p10  ;;  %p3220_p3 = scmp.lt.u32.totalorder %s3211_s5, %s3416_s28 }
  0x15   : > { %p3219_p2 = por %p3218_p1, %p3217_p0 }
  0x16   : > { %p3215_p13 = pneg %p3214_p12 }
  0x17   : > { %p3221_p4 = por %p3220_p3, %p3219_p2 }
  0x19   : > { %p3222_p6 = pnand %p3221_p4, %p3215_p13 }
  0x1b   : > { %3225 = shalt.err (!%p3222_p6)
}
  0x1c   : > { %s3226_s11 = scalar_lea.vmem %s3418_s30, 22528  ;;  %s3311_s12 = smov [#allocation2]  }
  0x1d   : > { %p3227_p10 = scmp.ne.s32.totalorder %s3418_s30, %s3226_s11  ;;  %s3231_s18 = sshll.u32 %s3311_s12, 4  ;;  %s3232_s18 = int_to_ptr.vmem [resolvable:$false] %s3231_s18 }
  0x1e   : > { %s3233_s19 = scalar_lea.vmem %s3232_s18, 45056  ;;  %p3234_p9 = scmp.lt.s32.totalorder %s3418_s30, %s3232_s18 }
  0x1f   : > { %p3229_p12 = pnand %p3227_p10, %p3213_p11  ;;  %p3235_p0 = scmp.lt.s32.totalorder %s3233_s19, %s3226_s11 }
  0x21   : > { %p3230_p5 = pneg %p3229_p12  ;;  %p3236_p1 = por %p3235_p0, %p3234_p9 }
  0x23   : > { %p3237_p2 = pnand %p3236_p1, %p3230_p5 }
  0x25   : > { %3240 = shalt.err (!%p3237_p2)
}
  0x26   : > { %s3312_s23 = smov 256   ;;  %s3313_s24 = smov 16  }
  0x27   : > { %2818 = dma.hbm_to_vmem [thread:$0]  (!%p3409_p8), %s3416_s28, 22528, %s3418_s30, %s135_s4, %s3312_s23, %s3312_s23, %s3313_s24  }
  0x28   : > { %p172_p13 = scmp.lt.s32.totalorder %s3309_s15, 3  ;;  %s2807_s26 = smul.u32 23, %s3405_s22 }
  0x29   : > { %p3923_p9 = scmp.ge.s32.totalorder %s3309_s15, 1  ;;  %s2808_s29 = smul.u32 368, %s3309_s15 }
  0x2a   : > { %s159_s8 = scalar_lea.vmem [#allocation4], %s2807_s26  ;;  %s156_s28 = scalar_lea.sflag [#allocation5], %s3405_s22 }
  0x2b   : > { %p3453_p5 = pnand %p3923_p9, %p172_p13  ;;  %s3461_s7 = scalar_lea.hbm %s3917_s2, %s2808_s29 }
  0x2c   : > { %s167_s9 = sshll.u32 %s159_s8, 4  ;;  %s3241_s30 = scalar_lea.hbm %s3461_s7, 368  ;;  %s168_s9 = int_to_ptr.vmem [resolvable:$true] %s167_s9 }
  0x2d   : > { %s3924_s27 = scalar_select %p3453_p5, 1, 0 }
  0x2e   : > { %p3242_p3 = scmp.ne.s32.totalorder %s3461_s7, %s3241_s30  ;;  %s3246_s10 = scalar_lea.hbm %s3917_s2, 736 }
  0x2f   : > { %p3247_p10 = scmp.lt.u32.totalorder %s3461_s7, %s3917_s2  ;;  %p3248_p12 = scmp.lt.u32.totalorder %s3246_s10, %s3241_s30 }
  0x30   : > { %p3244_p4 = pnand %p3242_p3, %p3213_p11  ;;  %p3250_p1 = scmp.lt.u32.totalorder %s3241_s30, %s3461_s7 }
  0x31   : > { %p3249_p0 = por %p3248_p12, %p3247_p10 }
  0x32   : > { %p3245_p6 = pneg %p3244_p4 }
  0x33   : > { %p3251_p2 = por %p3250_p1, %p3249_p0 }
  0x35   : > { %p3252_p13 = pnand %p3251_p2, %p3245_p6 }
  0x37   : > { %3255 = shalt.err (!%p3252_p13)
}
  0x38   : > { %s3256_s22 = scalar_lea.vmem %s168_s9, 368  ;;  %s3314_s18 = smov [#allocation4]  }
  0x39   : > { %p3257_p9 = scmp.ne.s32.totalorder %s168_s9, %s3256_s22  ;;  %s3261_s19 = sshll.u32 %s3314_s18, 4  ;;  %s3262_s19 = int_to_ptr.vmem [resolvable:$false] %s3261_s19 }
  0x3a   : > { %s3263_s23 = scalar_lea.vmem %s3262_s19, 736  ;;  %p3264_p7 = scmp.lt.s32.totalorder %s168_s9, %s3262_s19 }
  0x3b   : > { %p3259_p3 = pnand %p3257_p9, %p3213_p11  ;;  %p3265_p5 = scmp.lt.s32.totalorder %s3263_s23, %s3256_s22 }
  0x3d   : > { %p3260_p4 = pneg %p3259_p3  ;;  %p3266_p10 = por %p3265_p5, %p3264_p7 }
  0x3f   : > { %p3267_p12 = pnand %p3266_p10, %p3260_p4 }
  0x41   : > { %3270 = shalt.err (!%p3267_p12)
}
  0x42   : > { %2821 = dma.hbm_to_vmem [thread:$0]  (!%p3409_p8), %s3461_s7, 368, %s168_s9, %s156_s28  }
  0x43   : > { %p3925_p6 = scmp.ne.s32.totalorder %s3924_s27, 0 }
  0x44   : > { %s178_s24 = sand.u32 (!%p3925_p6), 1, %s3301_s13   ;;  %p3926_p11 = scmp.ne.s32.totalorder (!%p3925_p6), %s3921_s21, 0 }
  0x45   : > { %176 = sbr.rel (%p3925_p6) target bundleno = 3243 (0xcab), region = 32  ;;  %s179_s29 = scalar_lea.sflag (!%p3925_p6), [#allocation3], %s178_s24 }
  0x46   : > { %s2809_s26 = smul.u32 (!%p3925_p6), 1408, %s178_s24 }
  0x48   : > { %s3486_s5 = scalar_lea.vmem (!%p3925_p6), [#allocation2], %s2809_s26 }
  0x4c   : > { %3288 = dma.done.wait (%p3926_p11), %s179_s29, 22528  }
  0x4d   : > { %3290 = vsyncadd (%p3926_p11), %s179_s29, 4294944768  ;;  %s2810_s6 = smul.u32 23, %s178_s24  ;;  %s188_s25 = scalar_lea.sflag [#allocation5], %s178_s24 }
  0x4f   : > { %s3492_s8 = scalar_lea.vmem [#allocation4], %s2810_s6 }
  0x50   : > { %3292 = dma.done.wait (%p3926_p11), %s188_s25, 368  }
  0x51   : > { %3294 = vsyncadd (%p3926_p11), %s188_s25, 4294966928  ;;  %v3315_v0 = vmov 0   ;;  %v3316_v1 = vmov 0.0   ;;  %v2917_v2 = vld [vmem:[%s3486_s5 + $0x4] ss:$16 sps:$4 sm:$0xff]   ;;  %v216_v13 = vld [vmem:[%s3915_s0 + $0x8] sm:$0xff]  ;;  %v228_v38 = vlaneseq }
  0x52   : > { %314 = vmatprep.mubr.bf16.mxu0 %v3315_v0  ;;  %2745 = vmatprep.subr.bf16.mxu1 %v3316_v1  ;;  %v2919_v3 = vld [vmem:[%s3486_s5] ss:$16 sps:$4 sm:$0xff]   ;;  %v2920_v4 = vld [vmem:[%s3486_s5 + $0x24] ss:$16 sps:$4 sm:$0xff]   ;;  %vm278_vm0 = vcmask 523264   ;;  %vm3317_vm1 = vmmov 0  }
  0x53   : > { %2884 = vset.pattern.permute.xlu0 %v3315_v0  ;;  %282 = vmatprep.subr.bf16.mxu0 %v2917_v2  ;;  %v2922_v5 = vld [vmem:[%s3486_s5 + $0x20] ss:$16 sps:$4 sm:$0xff]   ;;  %v2923_v6 = vld [vmem:[%s3486_s5 + $0x44] ss:$16 sps:$4 sm:$0xff]   ;;  %v2963_v37 = vld [vmem:[%s3486_s5 + $0x8c] ss:$16 sps:$4 sm:$0xff]  }
  0x54   : > { %283 = vmatpush1.bf16.msra.mxu0 %v2919_v3  ;;  %v2925_v7 = vld [vmem:[%s3486_s5 + $0x40] ss:$16 sps:$4 sm:$0xff]   ;;  %v2926_v8 = vld [vmem:[%s3486_s5 + $0x64] ss:$16 sps:$4 sm:$0xff]   ;;  %2761 = vmatprep.mubr.msk.bf16.mxu1 %vm3317_vm1, %v3316_v1  ;;  %v3550_v39 = vshrl.u32 %v228_v38, 7  ;;  %vm442_vm2 = vcmask 31744  }
  0x55   : > { %284 = vmatprep.subr.bf16.mxu0 %v2920_v4  ;;  %v2932_v9 = vld [vmem:[%s3486_s5 + $0x480] ss:$16 sps:$4 sm:$0xff]   ;;  %v2931_v14 = vld [vmem:[%s3486_s5 + $0x84] ss:$16 sps:$4 sm:$0xff]   ;;  %v2961_v58 = vld [vmem:[%s3486_s5 + $0x88] ss:$16 sps:$4 sm:$0xff]  }
  0x56   : > { %v2928_v10 = vld [vmem:[%s3486_s5 + $0x60] ss:$16 sps:$4 sm:$0xff]   ;;  %2746 = vmatpush3.bf16.msra.mxu1 %v2932_v9  ;;  %v2935_v18 = vld [vmem:[%s3486_s5 + $0xa4] ss:$16 sps:$4 sm:$0xff]   ;;  %v3553_v40 = vsub.s32 0, %v3550_v39  ;;  %v3557_v42 = vsub.s32 1, %v3550_v39 }
  0x57   : > { %v2936_v11 = vld [vmem:[%s3486_s5 + $0x4a0] ss:$16 sps:$4 sm:$0xff]   ;;  %2747 = vmatprep.subr.bf16.mxu1 %v3316_v1  ;;  %v2939_v21 = vld [vmem:[%s3486_s5 + $0xc4] ss:$16 sps:$4 sm:$0xff]   ;;  %v2966_v60 = vld [vmem:[%s3486_s5 + $0xac] ss:$16 sps:$4 sm:$0xff]  }
  0x58   : > { %285 = vmatpush1.bf16.msra.mxu0 %v2922_v5  ;;  %v215_v12 = vld [vmem:[%s3915_s0] sm:$0xff]  ;;  %v2964_v61 = vld [vmem:[%s3486_s5 + $0xa8] ss:$16 sps:$4 sm:$0xff]   ;;  %v2969_v62 = vld [vmem:[%s3486_s5 + $0xcc] ss:$16 sps:$4 sm:$0xff]   ;;  %vm465_vm3 = vcmask 64544  }
  0x59   : > { %286 = vmatprep.subr.bf16.mxu0 %v2923_v6  ;;  %v225_v15 = vpack.c.bf16 %v216_v13, %v215_v12  ;;  %v2940_v16 = vld [vmem:[%s3486_s5 + $0x4c0] ss:$16 sps:$4 sm:$0xff]   ;;  %v2943_v24 = vld [vmem:[%s3486_s5 + $0xe4] ss:$16 sps:$4 sm:$0xff]   ;;  %v2967_v63 = vld [vmem:[%s3486_s5 + $0xc8] ss:$16 sps:$4 sm:$0xff]  }
  0x5a   : > { %2748 = vmatpush3.bf16.msra.mxu1 %v2936_v11  ;;  %v2929_v17 = vld [vmem:[%s3486_s5 + $0x80] ss:$16 sps:$4 sm:$0xff]   ;;  %v2947_v27 = vld [vmem:[%s3486_s5 + $0x104] ss:$16 sps:$4 sm:$0xff]   ;;  %v2972_v2 = vld [vmem:[%s3486_s5 + $0xec] ss:$16 sps:$4 sm:$0xff]  }
  0x5b   : > { %2749 = vmatprep.subr.bf16.mxu1 %v3316_v1  ;;  %v2933_v19 = vld [vmem:[%s3486_s5 + $0xa0] ss:$16 sps:$4 sm:$0xff]   ;;  %v2951_v29 = vld [vmem:[%s3486_s5 + $0x124] ss:$16 sps:$4 sm:$0xff]   ;;  %v2970_v3 = vld [vmem:[%s3486_s5 + $0xe8] ss:$16 sps:$4 sm:$0xff]  }
  0x5c   : > { %287 = vmatpush1.bf16.msra.mxu0 %v2925_v7  ;;  %v2944_v20 = vld [vmem:[%s3486_s5 + $0x4e0] ss:$16 sps:$4 sm:$0xff]   ;;  %v2955_v31 = vld [vmem:[%s3486_s5 + $0x144] ss:$16 sps:$4 sm:$0xff]   ;;  %v2975_v4 = vld [vmem:[%s3486_s5 + $0x10c] ss:$16 sps:$4 sm:$0xff]  }
  0x5d   : > { %288 = vmatprep.subr.bf16.mxu0 %v2926_v8  ;;  %v2948_v22 = vld [vmem:[%s3486_s5 + $0x500] ss:$16 sps:$4 sm:$0xff]   ;;  %v2959_v34 = vld [vmem:[%s3486_s5 + $0x164] ss:$16 sps:$4 sm:$0xff]   ;;  %v2973_v5 = vld [vmem:[%s3486_s5 + $0x108] ss:$16 sps:$4 sm:$0xff]  }
  0x5e   : > { %2750 = vmatpush3.bf16.msra.mxu1 %v2940_v16  ;;  %v2937_v23 = vld [vmem:[%s3486_s5 + $0xc0] ss:$16 sps:$4 sm:$0xff]   ;;  %v2978_v6 = vld [vmem:[%s3486_s5 + $0x12c] ss:$16 sps:$4 sm:$0xff]   ;;  %v2976_v7 = vld [vmem:[%s3486_s5 + $0x128] ss:$16 sps:$4 sm:$0xff]  }
  0x5f   : > { %2751 = vmatprep.subr.bf16.mxu1 %v3316_v1  ;;  %v2952_v25 = vld [vmem:[%s3486_s5 + $0x520] ss:$16 sps:$4 sm:$0xff]   ;;  %v2981_v8 = vld [vmem:[%s3486_s5 + $0x14c] ss:$16 sps:$4 sm:$0xff]   ;;  %v2979_v9 = vld [vmem:[%s3486_s5 + $0x148] ss:$16 sps:$4 sm:$0xff]  }
  0x60   : > { %289 = vmatpush1.bf16.msra.mxu0 %v2928_v10  ;;  %v2941_v26 = vld [vmem:[%s3486_s5 + $0xe0] ss:$16 sps:$4 sm:$0xff]   ;;  %v2984_v10 = vld [vmem:[%s3486_s5 + $0x16c] ss:$16 sps:$4 sm:$0xff]   ;;  %v2982_v11 = vld [vmem:[%s3486_s5 + $0x168] ss:$16 sps:$4 sm:$0xff]  }
  0x61   : > { %773 = vmatprep.subr.bf16.mxu0 %v2931_v14  ;;  %v2945_v28 = vld [vmem:[%s3486_s5 + $0x100] ss:$16 sps:$4 sm:$0xff]   ;;  %s3321_s28 = smov 124   ;;  %vm496_vm4 = vcmask 97344   ;;  %s3325_s30 = smov 120   ;;  %vm527_vm5 = vcmask 130144  }
  0x62   : > { %2752 = vmatpush3.bf16.msra.mxu1 %v2944_v20  ;;  %v2949_v30 = vld [vmem:[%s3486_s5 + $0x120] ss:$16 sps:$4 sm:$0xff]   ;;  %s3331_s15 = smov 116   ;;  %p2688_p7 = scmp.ne.s32.totalorder %s3381_s16, 0 }
  0x63   : > { %2541 = vmatmul.mubr.msk.bf16.vlgmr.msra.gmra.mrb[0].mxu0 %vm278_vm0, %v225_v15  ;;  %2753 = vmatprep.subr.bf16.mxu1 %v3316_v1  ;;  %v2953_v32 = vld [vmem:[%s3486_s5 + $0x140] ss:$16 sps:$4 sm:$0xff]  }
  0x64   : > { %774 = vmatpush1.bf16.msra.mxu0 %v2929_v17  ;;  %805 = vmatprep.mubr.bf16.mxu0 %v3315_v0  ;;  %v2956_v33 = vld [vmem:[%s3486_s5 + $0x540] ss:$16 sps:$4 sm:$0xff]  }
  0x65   : > { %775 = vmatprep.subr.bf16.mxu0 %v2935_v18  ;;  %v2957_v35 = vld [vmem:[%s3486_s5 + $0x160] ss:$16 sps:$4 sm:$0xff]  }
  0x66   : > { %2754 = vmatpush3.bf16.msra.mxu1 %v2948_v22  ;;  %v2960_v36 = vld [vmem:[%s3486_s5 + $0x560] ss:$16 sps:$4 sm:$0xff]  }
  0x67   : > { %2755 = vmatprep.subr.bf16.mxu1 %v3316_v1  ;;  %v226_v41 = vld [vmem:[%s3492_s8] sm:$0x3]  ;;  %v2542_v12 = vld [vmem:[%s3492_s8 + $0x12] ss:$0 sm:$0xff] }
  0x68   : > { %776 = vmatpush1.bf16.msra.mxu0 %v2933_v19  ;;  %v231_v43 = vrot.slane %v226_v41, %v3553_v40  ;;  %v235_v44 = vrot.slane %v226_v41, %v3557_v42 }
  0x69   : > { %777 = vmatprep.subr.bf16.mxu0 %v2939_v21 }
  0x6a   : > { %2756 = vmatpush3.bf16.msra.mxu1 %v2952_v25 }
  0x6b   : > { %2757 = vmatprep.subr.bf16.mxu1 %v3316_v1 }
  0x6c   : > { %778 = vmatpush1.bf16.msra.mxu0 %v2937_v23 }
  0x6d   : > { %779 = vmatprep.subr.bf16.mxu0 %v2943_v24 }
  0x6e   : > { %2758 = vmatpush3.bf16.msra.mxu1 %v2956_v33 }
  0x6f   : > { %2759 = vmatprep.subr.bf16.mxu1 %v3316_v1 }
  0x70   : > { %780 = vmatpush1.bf16.msra.mxu0 %v2941_v26 }
  0x71   : > { %781 = vmatprep.subr.bf16.mxu0 %v2947_v27 }
  0x72   : > { %2760 = vmatpush3.bf16.msra.mxu1 %v2960_v36 }
  0x73   : > { %816 = vmatprep.subr.bf16.mxu1 %v2963_v37 }
  0x74   : > { %782 = vmatpush1.bf16.msra.mxu0 %v2945_v28 }
  0x75   : > { %783 = vmatprep.subr.bf16.mxu0 %v2951_v29 }
  0x78   : > { %784 = vmatpush1.bf16.msra.mxu0 %v2949_v30 }
  0x79   : > { %785 = vmatprep.subr.bf16.mxu0 %v2955_v31 }
  0x7c   : > { %786 = vmatpush1.bf16.msra.mxu0 %v2953_v32 }
  0x7d   : > { %787 = vmatprep.subr.bf16.mxu0 %v2959_v34 }
  0x80   : > { %788 = vmatpush1.bf16.msra.mxu0 %v2957_v35 }
 0x136   : > { %v316_v45 = vpop.f32.mrb[0].mxu0 }
 0x137   : > { %v317_v46 = vadd.f32 %v316_v45, %v231_v43  ;;  %v318_v47 = vpop.f32.mrb[1].mxu0 }
 0x138   : > { %v319_v48 = vadd.f32 %v318_v47, %v235_v44  ;;  %v320_v49 = vpop.f32.mrb[2].mxu0 }
 0x139   : > { %v321_v50 = vadd.f32 %v320_v49, %v231_v43  ;;  %v322_v51 = vpop.f32.mrb[3].mxu0  ;;  %v325_v53 = vmax.f32 %v317_v46, 0.0 }
 0x13a   : > { %v323_v52 = vadd.f32 %v322_v51, %v235_v44  ;;  %v326_v55 = vmax.f32 %v319_v48, 0.0  ;;  %v3318_v44 = vmov 1  }
 0x13b   : > { %v327_v54 = vmax.f32 %v321_v50, 0.0  ;;  %2885 = vset.pattern.permute.xlu1 %v3318_v44 }
 0x13c   : > { %v328_v56 = vmax.f32 %v323_v52, 0.0  ;;  %v2985_v52 = vld [vmem:[%s3486_s5 + $0x180] ss:$16 sps:$4 sm:$0xff]  }
 0x13d   : > { %v591_v57 = vpack.c.bf16 %v327_v54, %v325_v53  ;;  %v2987_v53 = vld [vmem:[%s3486_s5 + $0x184] ss:$16 sps:$4 sm:$0xff]   ;;  %v2988_v54 = vld [vmem:[%s3486_s5 + $0x188] ss:$16 sps:$4 sm:$0xff]  }
 0x13e   : > { %v345_v59 = vpack.c.bf16 %v328_v56, %v326_v55  ;;  %v3319_v55 = vmov 2   ;;  %v2990_v56 = vld [vmem:[%s3486_s5 + $0x18c] ss:$16 sps:$4 sm:$0xff]   ;;  %1130 = vmatprep.subr.bf16.mxu0 %v2987_v53 }
 0x13f   : > { %806 = vmatmul.mubr.bf16.vlgmr.msra.gmra.mrb[4].mxu0 %v591_v57 }
 0x140   : > { %2762 = vmatmul.mubr.bf16.vlgmr.msra.gmra.mrb[0].mxu1 %v345_v59  ;;  %1162 = vmatprep.mubr.bf16.mxu0 %v3315_v0  ;;  %v2994_v59 = vld [vmem:[%s3486_s5 + $0x1a8] ss:$16 sps:$4 sm:$0xff]  }
 0x141   : > { %817 = vmatpush1.bf16.msra.mxu1 %v2961_v58  ;;  %848 = vmatprep.mubr.bf16.mxu1 %v3315_v0  ;;  %v2993_v58 = vld [vmem:[%s3486_s5 + $0x1a4] ss:$16 sps:$4 sm:$0xff]  }
 0x142   : > { %818 = vmatprep.subr.bf16.mxu1 %v2966_v60  ;;  %1131 = vmatpush1.bf16.msra.mxu0 %v2985_v52  ;;  %v2996_v60 = vld [vmem:[%s3486_s5 + $0x1ac] ss:$16 sps:$4 sm:$0xff]  }
 0x143   : > { %1132 = vmatprep.subr.bf16.mxu0 %v2993_v58 }
 0x145   : > { %819 = vmatpush1.bf16.msra.mxu1 %v2964_v61 }
 0x146   : > { %820 = vmatprep.subr.bf16.mxu1 %v2969_v62  ;;  %v3320_v62 = vmov 3  }
 0x149   : > { %821 = vmatpush1.bf16.msra.mxu1 %v2967_v63 }
 0x14a   : > { %822 = vmatprep.subr.bf16.mxu1 %v2972_v2  ;;  %v2999_v2 = vld [vmem:[%s3486_s5 + $0x1c4] ss:$16 sps:$4 sm:$0xff]  }
 0x14d   : > { %823 = vmatpush1.bf16.msra.mxu1 %v2970_v3  ;;  %v3002_v3 = vld [vmem:[%s3486_s5 + $0x1cc] ss:$16 sps:$4 sm:$0xff]  }
 0x14e   : > { %824 = vmatprep.subr.bf16.mxu1 %v2975_v4 }
 0x151   : > { %825 = vmatpush1.bf16.msra.mxu1 %v2973_v5  ;;  %v2997_v5 = vld [vmem:[%s3486_s5 + $0x1c0] ss:$16 sps:$4 sm:$0xff]  }
 0x152   : > { %826 = vmatprep.subr.bf16.mxu1 %v2978_v6  ;;  %v3000_v6 = vld [vmem:[%s3486_s5 + $0x1c8] ss:$16 sps:$4 sm:$0xff]  }
 0x155   : > { %827 = vmatpush1.bf16.msra.mxu1 %v2976_v7 }
 0x156   : > { %828 = vmatprep.subr.bf16.mxu1 %v2981_v8 }
 0x159   : > { %829 = vmatpush1.bf16.msra.mxu1 %v2979_v9  ;;  %v3003_v9 = vld [vmem:[%s3486_s5 + $0x1e0] ss:$16 sps:$4 sm:$0xff]  }
 0x15a   : > { %830 = vmatprep.subr.bf16.mxu1 %v2984_v10  ;;  %v3005_v10 = vld [vmem:[%s3486_s5 + $0x1e4] ss:$16 sps:$4 sm:$0xff]  }
 0x15d   : > { %831 = vmatpush1.bf16.msra.mxu1 %v2982_v11  ;;  %v3006_v11 = vld [vmem:[%s3486_s5 + $0x1e8] ss:$16 sps:$4 sm:$0xff]  }
 0x15e   : > { %1173 = vmatprep.subr.bf16.mxu1 %v2990_v56 }
 0x160   : > { %849 = vmatmul.mubr.bf16.vlgmr.msra.gmra.mrb[4].mxu1 %v591_v57  ;;  %v2991_v57 = vld [vmem:[%s3486_s5 + $0x1a0] ss:$16 sps:$4 sm:$0xff]  }
 0x161   : > { %1205 = vmatprep.mubr.bf16.mxu1 %v3315_v0  ;;  %1174 = vmatpush1.bf16.msra.mxu1 %v2988_v54 }
 0x162   : > { %1175 = vmatprep.subr.bf16.mxu1 %v2996_v60  ;;  %1133 = vmatpush1.bf16.msra.mxu0 %v2991_v57 }
 0x163   : > { %1134 = vmatprep.subr.bf16.mxu0 %v2999_v2 }
 0x165   : > { %1176 = vmatpush1.bf16.msra.mxu1 %v2994_v59 }
 0x166   : > { %1177 = vmatprep.subr.bf16.mxu1 %v3002_v3  ;;  %1135 = vmatpush1.bf16.msra.mxu0 %v2997_v5 }
 0x167   : > { %1136 = vmatprep.subr.bf16.mxu0 %v3005_v10 }
 0x169   : > { %1178 = vmatpush1.bf16.msra.mxu1 %v3000_v6 }
 0x16a   : > { %1137 = vmatpush1.bf16.msra.mxu0 %v3003_v9 }
 0x212   : > { %v3580_v13 = vpop.f32.mrb[4].mxu0 }
 0x213   : > { %v435_v14 = vpop.f32.mrb[0].mxu1  ;;  %v3582_v15 = vpop.f32.mrb[5].mxu0 }
 0x214   : > { %v3584_v16 = vadd.f32 %v2542_v12, %v435_v14  ;;  %v2763_v17 = vpop.f32.mrb[1].mxu1  ;;  %v3586_v18 = vpop.f32.mrb[6].mxu0 }
 0x215   : > { %v438_v19 = vpop.f32.mrb[2].mxu1  ;;  %v3588_v20 = vpop.f32.mrb[7].mxu0  ;;  %v3011_v17 = vld [vmem:[%s3486_s5 + $0x204] ss:$16 sps:$4 sm:$0xff]  }
 0x216   : > { %v3590_v21 = vadd.f32 %v2542_v12, %v438_v19  ;;  %v2764_v22 = vpop.f32.mrb[3].mxu1  ;;  %v443_v23 = vsel %vm442_vm2, %v3584_v16, -inf  ;;  %v466_v25 = vsel %vm465_vm3, %v3584_v16, -inf  ;;  %v3008_v12 = vld [vmem:[%s3486_s5 + $0x1ec] ss:$16 sps:$4 sm:$0xff]   ;;  %1138 = vmatprep.subr.bf16.mxu0 %v3011_v17 }
 0x217   : > { %444 = vmax.xlane.f32.xlu0 %v443_v23  ;;  %1179 = vmatprep.subr.bf16.mxu1 %v3008_v12  ;;  %v3014_v19 = vld [vmem:[%s3486_s5 + $0x20c] ss:$16 sps:$4 sm:$0xff]   ;;  %v3009_v22 = vld [vmem:[%s3486_s5 + $0x200] ss:$16 sps:$4 sm:$0xff]   ;;  %v3012_v23 = vld [vmem:[%s3486_s5 + $0x208] ss:$16 sps:$4 sm:$0xff]  }
 0x218   : > { %v446_v24 = vsel %vm442_vm2, %v3590_v21, -inf  ;;  %v469_v43 = vsel %vm465_vm3, %v3590_v21, -inf  ;;  %1180 = vmatpush1.bf16.msra.mxu1 %v3006_v11  ;;  %1139 = vmatpush1.bf16.msra.mxu0 %v3009_v22 }
 0x219   : > { %1181 = vmatprep.subr.bf16.mxu1 %v3014_v19 }
 0x21b   : > { %447 = vmax.xlane.f32.xlu0 %v446_v24  ;;  %v3017_v24 = vld [vmem:[%s3486_s5 + $0x224] ss:$16 sps:$4 sm:$0xff]  }
 0x21c   : > { %1182 = vmatpush1.bf16.msra.mxu1 %v3012_v23  ;;  %1140 = vmatprep.subr.bf16.mxu0 %v3017_v24 }
 0x21f   : > { %467 = vmax.xlane.f32.xlu0 %v466_v25  ;;  %v3020_v25 = vld [vmem:[%s3486_s5 + $0x22c] ss:$16 sps:$4 sm:$0xff]  }
 0x220   : > { %1183 = vmatprep.subr.bf16.mxu1 %v3020_v25 }
 0x233   : > { %v3598_v26 = vpop.f32.mrb[4].mxu1 }
 0x234   : > { %v3600_v27 = vpop.f32.mrb[5].mxu1 }
 0x235   : > { %v3602_v28 = vpop.f32.mrb[6].mxu1 }
 0x236   : > { %v3604_v29 = vpop.f32.mrb[7].mxu1 }
 0x2a4   : > { %v445_v30 = vpop.xlane.xlu0 %444 }
 0x2a5   : > { %v449_v31 = vsub.f32 %v3584_v16, %v445_v30  ;;  %v3015_v30 = vld [vmem:[%s3486_s5 + $0x220] ss:$16 sps:$4 sm:$0xff]  }
 0x2a6   : > { %1141 = vmatpush1.bf16.msra.mxu0 %v3015_v30 }
 0x2a7   : > { %v451_v32 = vmul.f32 1.442695, %v449_v31  ;;  %v3018_v31 = vld [vmem:[%s3486_s5 + $0x228] ss:$16 sps:$4 sm:$0xff]  }
 0x2a8   : > { %v448_v33 = vpop.xlane.xlu0 %447  ;;  %1184 = vmatpush1.bf16.msra.mxu1 %v3018_v31 }
 0x2a9   : > { %3137 = vpow2.f32 %v451_v32  ;;  %v450_v34 = vsub.f32 %v3590_v21, %v448_v33  ;;  %v3021_v32 = vld [vmem:[%s3486_s5 + $0x240] ss:$16 sps:$4 sm:$0xff]   ;;  %v3023_v33 = vld [vmem:[%s3486_s5 + $0x244] ss:$16 sps:$4 sm:$0xff]  }
 0x2aa   : > { %1142 = vmatprep.subr.bf16.mxu0 %v3023_v33 }
 0x2ab   : > { %v453_v35 = vmul.f32 1.442695, %v450_v34  ;;  %v3024_v34 = vld [vmem:[%s3486_s5 + $0x248] ss:$16 sps:$4 sm:$0xff]   ;;  %1143 = vmatpush1.bf16.msra.mxu0 %v3021_v32 }
 0x2ac   : > { %v468_v4 = vpop.xlane.xlu0 %467 }
 0x2ad   : > { %3139 = vpow2.f32 %v453_v35  ;;  %v472_v8 = vsub.f32 %v3584_v16, %v468_v4  ;;  %v3026_v35 = vld [vmem:[%s3486_s5 + $0x24c] ss:$16 sps:$4 sm:$0xff]  }
 0x2ae   : > { %1185 = vmatprep.subr.bf16.mxu1 %v3026_v35 }
 0x2af   : > { %v474_v14 = vmul.f32 1.442695, %v472_v8  ;;  %1186 = vmatpush1.bf16.msra.mxu1 %v3024_v34 }
 0x2b3   : > { %v3138_v36 = vpop.eup %3137 }
 0x2b4   : > { %v455_v37 = vsel %vm442_vm2, %v3138_v36, 0.0 }
 0x2b5   : > { %456 = vadd.xlane.f32.xlu1 %v455_v37  ;;  %v3032_v37 = vld [vmem:[%s3486_s5 + $0x26c] ss:$16 sps:$4 sm:$0xff]  }
 0x2b6   : > { %1187 = vmatprep.subr.bf16.mxu1 %v3032_v37  ;;  %v3323_v37 = vmov 5  }
 0x2b7   : > { %v3140_v38 = vpop.eup %3139 }
 0x2b8   : > { %v458_v41 = vsel %vm442_vm2, %v3140_v38, 0.0 }
 0x2b9   : > { %459 = vadd.xlane.f32.xlu1 %v458_v41  ;;  %v3030_v41 = vld [vmem:[%s3486_s5 + $0x268] ss:$16 sps:$4 sm:$0xff]  }
 0x2ba   : > { %1188 = vmatpush1.bf16.msra.mxu1 %v3030_v41 }
 0x2bd   : > { %470 = vmax.xlane.f32.xlu1 %v469_v43 }
 0x342   : > { %v457_v45 = vpop.xlane.xlu1 %456 }
 0x343   : > { %3141 = vrcp.f32 %v457_v45 }
 0x346   : > { %v460_v46 = vpop.xlane.xlu1 %459 }
 0x34a   : > { %v471_v47 = vpop.xlane.xlu1 %470 }
 0x34b   : > { %v473_v48 = vsub.f32 %v3590_v21, %v471_v47  ;;  %v3659_v47 = vsub.s32 2, %v3550_v39 }
 0x34d   : > { %v3142_v49 = vpop.eup %3141  ;;  %v476_v50 = vmul.f32 1.442695, %v473_v48 }
 0x34e   : > { %v462_v51 = vmul.f32 %v3142_v49, %v3138_v36  ;;  %v3029_v36 = vld [vmem:[%s3486_s5 + $0x264] ss:$16 sps:$4 sm:$0xff]  }
 0x34f   : > { %3143 = vpow2.f32 %v476_v50  ;;  %1144 = vmatprep.subr.bf16.mxu0 %v3029_v36 }
 0x350   : > { %3145 = vrcp.f32 %v460_v46  ;;  %869 = vperm.xlu0 %2884, %v462_v51   ;;  %880 = vperm.xlu1 %2885, %v462_v51  }
 0x351   : > { %3147 = vpow2.f32 %v474_v14 }
 0x354   : > { %2886 = vset.pattern.permute.xlu1 %v3319_v55 }
 0x355   : > { %892 = vperm.xlu1 %2886, %v462_v51  }
 0x359   : > { %v3621_v61 = vpop.eup %3143  ;;  %2887 = vset.pattern.permute.xlu1 %v3320_v62 }
 0x35a   : > { %v3146_v63 = vpop.eup %3145  ;;  %904 = vperm.xlu1 %2887, %v462_v51   ;;  %482 = vrot.lane.b32.xlu0 %v3621_v61, %s3321_s28  ;;  %v3665_v51 = vsub.s32 3, %v3550_v39 }
 0x35b   : > { %v464_v7 = vmul.f32 %v3146_v63, %v3140_v38  ;;  %v3027_v38 = vld [vmem:[%s3486_s5 + $0x260] ss:$16 sps:$4 sm:$0xff]   ;;  %v3651_v43 = vpop.eup %3147 }
 0x35c   : > { %1145 = vmatpush1.bf16.msra.mxu0 %v3027_v38 }
 0x35e   : > { %2888 = vset.pattern.permute.xlu1 %v3315_v0 }
 0x35f   : > { %874 = vperm.xlu1 %2888, %v464_v7  }
 0x363   : > { %2889 = vset.pattern.permute.xlu1 %v3318_v44  ;;  %v590_v44 = vld [vmem:[%s3492_s8 + $0x2] sm:$0xf] }
 0x364   : > { %884 = vperm.xlu1 %2889, %v464_v7   ;;  %v596_v45 = vrot.slane %v590_v44, %v3553_v40  ;;  %v600_v46 = vrot.slane %v590_v44, %v3557_v42  ;;  %v604_v50 = vrot.slane %v590_v44, %v3659_v47  ;;  %v608_v57 = vrot.slane %v590_v44, %v3665_v51 }
 0x366   : > { %v808_v48 = vadd.f32 %v3580_v13, %v596_v45  ;;  %v810_v49 = vadd.f32 %v3582_v15, %v600_v46  ;;  %v851_v54 = vadd.f32 %v3598_v26, %v604_v50  ;;  %v853_v15 = vadd.f32 %v3600_v27, %v608_v57 }
 0x367   : > { %v497_v26 = vsel %vm496_vm4, %v3584_v16, -inf  ;;  %v812_v8 = vadd.f32 %v3586_v18, %v596_v45  ;;  %v814_v9 = vadd.f32 %v3588_v20, %v600_v46  ;;  %v855_v12 = vadd.f32 %v3602_v28, %v604_v50  ;;  %v3035_v50 = vld [vmem:[%s3486_s5 + $0x284] ss:$16 sps:$4 sm:$0xff]  }
 0x368   : > { %2890 = vset.pattern.permute.xlu1 %v3319_v55  ;;  %v859_v52 = vmax.f32 %v808_v48, 0.0  ;;  %v860_v53 = vmax.f32 %v810_v49, 0.0  ;;  %v862_v4 = vmax.f32 %v853_v15, 0.0  ;;  %v857_v24 = vadd.f32 %v3604_v29, %v608_v57  ;;  %1487 = vmatprep.subr.bf16.mxu0 %v3035_v50  ;;  %v3041_v57 = vld [vmem:[%s3486_s5 + $0x2a4] ss:$16 sps:$4 sm:$0xff]  }
 0x369   : > { %896 = vperm.xlu1 %2890, %v464_v7   ;;  %v863_v10 = vmax.f32 %v812_v8, 0.0  ;;  %v864_v11 = vmax.f32 %v814_v9, 0.0  ;;  %v865_v23 = vmax.f32 %v855_v12, 0.0  ;;  %v500_v28 = vsel %vm496_vm4, %v3590_v21, -inf  ;;  %v3050_v15 = vld [vmem:[%s3486_s5 + $0x2cc] ss:$16 sps:$4 sm:$0xff]  }
 0x36a   : > { %v866_v32 = vmax.f32 %v857_v24, 0.0  ;;  %v3322_v29 = vmov 4   ;;  %v3059_v8 = vld [vmem:[%s3486_s5 + $0x304] ss:$16 sps:$4 sm:$0xff]   ;;  %v3062_v9 = vld [vmem:[%s3486_s5 + $0x30c] ss:$16 sps:$4 sm:$0xff]  }
 0x36b   : > { %2892 = vset.pattern.permute.xlu0 %v3322_v29  ;;  %v3068_v12 = vld [vmem:[%s3486_s5 + $0x32c] ss:$16 sps:$4 sm:$0xff]  }
 0x36c   : > { %v3074_v24 = vld [vmem:[%s3486_s5 + $0x34c] ss:$16 sps:$4 sm:$0xff]  }
 0x36d   : > { %2891 = vset.pattern.permute.xlu1 %v3320_v62  ;;  %v861_v62 = vmax.f32 %v851_v54, 0.0  ;;  %v3033_v54 = vld [vmem:[%s3486_s5 + $0x280] ss:$16 sps:$4 sm:$0xff]  }
 0x36e   : > { %908 = vperm.xlu1 %2891, %v464_v7  }
 0x372   : > { %480 = vrot.lane.b32.xlu1 %v3651_v43, %s3321_s28 }
 0x373   : > { %2893 = vset.pattern.permute.xlu1 %v3323_v37 }
 0x3cf   : > { %v881_v55 = vpop.permute.xlu1 %880  ;;  %v870_v56 = vpop.permute.xlu0 %869 }
 0x3d0   : > { %v887_v58 = vmul.f32 %v881_v55, %v860_v53  ;;  %v877_v59 = vmul.f32 %v870_v56, %v859_v52  ;;  %v3038_v52 = vld [vmem:[%s3486_s5 + $0x28c] ss:$16 sps:$4 sm:$0xff]   ;;  %v3324_v53 = vmov 6   ;;  %v3036_v55 = vld [vmem:[%s3486_s5 + $0x288] ss:$16 sps:$4 sm:$0xff]  }
 0x3d1   : > { %1530 = vmatprep.subr.bf16.mxu1 %v3038_v52 }
 0x3d2   : > { %v889_v60 = vadd.f32 %v887_v58, %v877_v59  ;;  %v3042_v58 = vld [vmem:[%s3486_s5 + $0x2a8] ss:$16 sps:$4 sm:$0xff]   ;;  %v3044_v59 = vld [vmem:[%s3486_s5 + $0x2ac] ss:$16 sps:$4 sm:$0xff]  }
 0x3d3   : > { %v483_v13 = vpop.permute.xlu0 %482 }
 0x3d4   : > { %v893_v63 = vpop.permute.xlu1 %892  ;;  %v489_v2 = vsel %vm442_vm2, %v483_v13, 0.0  ;;  %v3047_v13 = vld [vmem:[%s3486_s5 + $0x2c4] ss:$16 sps:$4 sm:$0xff]  }
 0x3d5   : > { %v899_v39 = vmul.f32 %v893_v63, %v861_v62  ;;  %490 = vadd.xlane.f32.xlu0 %v489_v2  ;;  %v3045_v2 = vld [vmem:[%s3486_s5 + $0x2c0] ss:$16 sps:$4 sm:$0xff]  }
 0x3d7   : > { %v901_v3 = vadd.f32 %v899_v39, %v889_v60  ;;  %v3326_v60 = vmov 7   ;;  %v3048_v39 = vld [vmem:[%s3486_s5 + $0x2c8] ss:$16 sps:$4 sm:$0xff]  }
 0x3d9   : > { %v905_v5 = vpop.permute.xlu1 %904  ;;  %498 = vmax.xlane.f32.xlu0 %v497_v26  ;;  %v3051_v26 = vld [vmem:[%s3486_s5 + $0x2e0] ss:$16 sps:$4 sm:$0xff]  }
 0x3da   : > { %v911_v6 = vmul.f32 %v905_v5, %v862_v4  ;;  %v3053_v5 = vld [vmem:[%s3486_s5 + $0x2e4] ss:$16 sps:$4 sm:$0xff]  }
 0x3dc   : > { %v913_v7 = vadd.f32 %v911_v6, %v901_v3  ;;  %v3054_v6 = vld [vmem:[%s3486_s5 + $0x2e8] ss:$16 sps:$4 sm:$0xff]  }
 0x3de   : > { %v875_v27 = vpop.permute.xlu1 %874 }
 0x3df   : > { %v878_v17 = vmul.f32 %v875_v27, %v863_v10  ;;  %v3057_v27 = vld [vmem:[%s3486_s5 + $0x300] ss:$16 sps:$4 sm:$0xff]   ;;  %v3060_v10 = vld [vmem:[%s3486_s5 + $0x308] ss:$16 sps:$4 sm:$0xff]  }
 0x3e3   : > { %v885_v14 = vpop.permute.xlu1 %884 }
 0x3e4   : > { %v888_v19 = vmul.f32 %v885_v14, %v864_v11  ;;  %v3065_v11 = vld [vmem:[%s3486_s5 + $0x324] ss:$16 sps:$4 sm:$0xff]   ;;  %v3063_v14 = vld [vmem:[%s3486_s5 + $0x320] ss:$16 sps:$4 sm:$0xff]  }
 0x3e6   : > { %v890_v22 = vadd.f32 %v888_v19, %v878_v17  ;;  %v3066_v17 = vld [vmem:[%s3486_s5 + $0x328] ss:$16 sps:$4 sm:$0xff]   ;;  %v3069_v19 = vld [vmem:[%s3486_s5 + $0x340] ss:$16 sps:$4 sm:$0xff]  }
 0x3e8   : > { %v897_v25 = vpop.permute.xlu1 %896 }
 0x3e9   : > { %v900_v30 = vmul.f32 %v897_v25, %v865_v23  ;;  %v3072_v23 = vld [vmem:[%s3486_s5 + $0x348] ss:$16 sps:$4 sm:$0xff]   ;;  %v3077_v25 = vld [vmem:[%s3486_s5 + $0x364] ss:$16 sps:$4 sm:$0xff]  }
 0x3eb   : > { %v902_v31 = vadd.f32 %v900_v30, %v890_v22  ;;  %v3071_v22 = vld [vmem:[%s3486_s5 + $0x344] ss:$16 sps:$4 sm:$0xff]   ;;  %v3080_v30 = vld [vmem:[%s3486_s5 + $0x36c] ss:$16 sps:$4 sm:$0xff]  }
 0x3ed   : > { %v909_v33 = vpop.permute.xlu1 %908 }
 0x3ee   : > { %v912_v18 = vmul.f32 %v909_v33, %v866_v32  ;;  %v3078_v32 = vld [vmem:[%s3486_s5 + $0x368] ss:$16 sps:$4 sm:$0xff]  }
 0x3f0   : > { %v914_v34 = vadd.f32 %v912_v18, %v902_v31  ;;  %v3075_v31 = vld [vmem:[%s3486_s5 + $0x360] ss:$16 sps:$4 sm:$0xff]  }
 0x3f1   : > { %v481_v20 = vpop.permute.xlu1 %480 }
 0x3f2   : > { %v948_v35 = vpack.c.bf16 %v914_v34, %v913_v7  ;;  %v486_v36 = vsel %vm442_vm2, %v481_v20, 0.0  ;;  %v3056_v7 = vld [vmem:[%s3486_s5 + $0x2ec] ss:$16 sps:$4 sm:$0xff]  }
 0x3f3   : > { %487 = vadd.xlane.f32.xlu1 %v486_v36 }
 0x3f4   : > { %1163 = vmatmul.mubr.bf16.vlgmr.msra.gmra.mrb[8].mxu0 %v948_v35  ;;  %1206 = vmatmul.mubr.bf16.vlgmr.msra.gmra.mrb[8].mxu1 %v948_v35 }
 0x3f5   : > { %1519 = vmatprep.mubr.bf16.mxu0 %v3315_v0  ;;  %1562 = vmatprep.mubr.bf16.mxu1 %v3315_v0 }
 0x3f6   : > { %1488 = vmatpush1.bf16.msra.mxu0 %v3033_v54  ;;  %1531 = vmatpush1.bf16.msra.mxu1 %v3036_v55 }
 0x3f7   : > { %501 = vmax.xlane.f32.xlu1 %v500_v28  ;;  %1489 = vmatprep.subr.bf16.mxu0 %v3041_v57 }
 0x3f8   : > { %1532 = vmatprep.subr.bf16.mxu1 %v3044_v59 }
 0x3fa   : > { %1533 = vmatpush1.bf16.msra.mxu1 %v3042_v58 }
 0x3fb   : > { %1534 = vmatprep.subr.bf16.mxu1 %v3050_v15 }
 0x3fe   : > { %1535 = vmatpush1.bf16.msra.mxu1 %v3048_v39 }
 0x3ff   : > { %1536 = vmatprep.subr.bf16.mxu1 %v3056_v7 }
 0x402   : > { %1537 = vmatpush1.bf16.msra.mxu1 %v3054_v6  ;;  %v531_v6 = vsel %vm527_vm5, %v3590_v21, -inf }
 0x403   : > { %1538 = vmatprep.subr.bf16.mxu1 %v3062_v9 }
 0x406   : > { %1539 = vmatpush1.bf16.msra.mxu1 %v3060_v10 }
 0x407   : > { %1540 = vmatprep.subr.bf16.mxu1 %v3068_v12 }
 0x40a   : > { %1541 = vmatpush1.bf16.msra.mxu1 %v3066_v17 }
 0x40b   : > { %1542 = vmatprep.subr.bf16.mxu1 %v3074_v24 }
 0x40e   : > { %1543 = vmatpush1.bf16.msra.mxu1 %v3072_v23 }
 0x40f   : > { %1544 = vmatprep.subr.bf16.mxu1 %v3080_v30 }
 0x412   : > { %1545 = vmatpush1.bf16.msra.mxu1 %v3078_v32 }
 0x462   : > { %v491_v48 = vpop.xlane.xlu0 %490 }
 0x466   : > { %v499_v63 = vpop.xlane.xlu0 %498 }
 0x467   : > { %v503_v4 = vsub.f32 %v3584_v16, %v499_v63 }
 0x480   : > { %v488_v38 = vpop.xlane.xlu1 %487 }
 0x481   : > { %3149 = vrcp.f32 %v488_v38  ;;  %v947_v38 = vld [vmem:[%s3492_s8 + $0x6] sm:$0xf] }
 0x482   : > { %v965_v55 = vrot.slane %v947_v38, %v3665_v51 }
 0x484   : > { %v502_v41 = vpop.xlane.xlu1 %501 }
 0x485   : > { %v504_v44 = vsub.f32 %v3590_v21, %v502_v41  ;;  %v953_v41 = vrot.slane %v947_v38, %v3553_v40 }
 0x487   : > { %v507_v45 = vmul.f32 1.442695, %v504_v44  ;;  %v957_v44 = vrot.slane %v947_v38, %v3557_v42 }
 0x489   : > { %3151 = vpow2.f32 %v507_v45 }
 0x48a   : > { %3153 = vrcp.f32 %v491_v48  ;;  %v961_v48 = vrot.slane %v947_v38, %v3659_v47 }
 0x48b   : > { %v3150_v46 = vpop.eup %3149 }
 0x48c   : > { %v493_v49 = vmul.f32 %v3150_v46, %v3651_v43  ;;  %v3039_v43 = vld [vmem:[%s3486_s5 + $0x2a0] ss:$16 sps:$4 sm:$0xff]  }
 0x48d   : > { %1490 = vmatpush1.bf16.msra.mxu0 %v3039_v43 }
 0x48e   : > { %1237 = vperm.xlu1 %2893, %v493_v49   ;;  %1226 = vperm.xlu0 %2892, %v493_v49  }
 0x48f   : > { %1491 = vmatprep.subr.bf16.mxu0 %v3047_v13 }
 0x491   : > { %1492 = vmatpush1.bf16.msra.mxu0 %v3045_v2 }
 0x492   : > { %2894 = vset.pattern.permute.xlu1 %v3324_v53  ;;  %1493 = vmatprep.subr.bf16.mxu0 %v3053_v5 }
 0x493   : > { %v3688_v56 = vpop.eup %3151  ;;  %1249 = vperm.xlu1 %2894, %v493_v49  }
 0x494   : > { %513 = vrot.lane.b32.xlu0 %v3688_v56, %s3325_s30  ;;  %v3154_v62 = vpop.eup %3153 }
 0x495   : > { %v495_v3 = vmul.f32 %v3154_v62, %v3621_v61  ;;  %v505_v61 = vmul.f32 1.442695, %v503_v4  ;;  %1494 = vmatpush1.bf16.msra.mxu0 %v3051_v26 }
 0x496   : > { %1495 = vmatprep.subr.bf16.mxu0 %v3059_v8 }
 0x497   : > { %2895 = vset.pattern.permute.xlu1 %v3326_v60  ;;  %3155 = vpow2.f32 %v505_v61 }
 0x498   : > { %1261 = vperm.xlu1 %2895, %v493_v49  }
 0x499   : > { %1496 = vmatpush1.bf16.msra.mxu0 %v3057_v27 }
 0x49a   : > { %1497 = vmatprep.subr.bf16.mxu0 %v3065_v11 }
 0x49c   : > { %2896 = vset.pattern.permute.xlu1 %v3322_v29 }
 0x49d   : > { %1231 = vperm.xlu1 %2896, %v495_v3   ;;  %1498 = vmatpush1.bf16.msra.mxu0 %v3063_v14 }
 0x49e   : > { %1499 = vmatprep.subr.bf16.mxu0 %v3071_v22 }
 0x4a1   : > { %2897 = vset.pattern.permute.xlu1 %v3323_v37  ;;  %1500 = vmatpush1.bf16.msra.mxu0 %v3069_v19  ;;  %v3722_v33 = vpop.eup %3155 }
 0x4a2   : > { %1241 = vperm.xlu1 %2897, %v495_v3   ;;  %1501 = vmatprep.subr.bf16.mxu0 %v3077_v25 }
 0x4a5   : > { %1502 = vmatpush1.bf16.msra.mxu0 %v3075_v31 }
 0x4a6   : > { %2898 = vset.pattern.permute.xlu1 %v3324_v53 }
 0x4a7   : > { %1253 = vperm.xlu1 %2898, %v495_v3  }
 0x4ab   : > { %2899 = vset.pattern.permute.xlu1 %v3326_v60 }
 0x4ac   : > { %1265 = vperm.xlu1 %2899, %v495_v3   ;;  %v528_v3 = vsel %vm527_vm5, %v3584_v16, -inf }
 0x4b0   : > { %511 = vrot.lane.b32.xlu1 %v3722_v33, %s3325_s30 }
 0x4c7   : > { %v1164_v18 = vpop.f32.mrb[8].mxu0  ;;  %v1207_v34 = vpop.f32.mrb[8].mxu1 }
 0x4c8   : > { %v1166_v20 = vpop.f32.mrb[9].mxu0  ;;  %v1209_v35 = vpop.f32.mrb[9].mxu1  ;;  %v1165_v45 = vadd.f32 %v1164_v18, %v953_v41  ;;  %v1208_v52 = vadd.f32 %v1207_v34, %v961_v48  ;;  %v3327_v34 = vmov 8  }
 0x4c9   : > { %v1168_v36 = vpop.f32.mrb[10].mxu0  ;;  %v1211_v28 = vpop.f32.mrb[10].mxu1  ;;  %v1167_v46 = vadd.f32 %v1166_v20, %v957_v44  ;;  %v1210_v62 = vadd.f32 %v1209_v35, %v965_v55  ;;  %2901 = vset.pattern.permute.xlu0 %v3327_v34  ;;  %2900 = vset.pattern.permute.xlu1 %v3327_v34 }
 0x4ca   : > { %v1170_v29 = vpop.f32.mrb[11].mxu0  ;;  %v1213_v37 = vpop.f32.mrb[11].mxu1  ;;  %v1216_v49 = vmax.f32 %v1165_v45, 0.0  ;;  %v1218_v59 = vmax.f32 %v1208_v52, 0.0  ;;  %v1169_v7 = vadd.f32 %v1168_v36, %v953_v41  ;;  %v1212_v10 = vadd.f32 %v1211_v28, %v961_v48  ;;  %v3086_v45 = vld [vmem:[%s3486_s5 + $0x38c] ss:$16 sps:$4 sm:$0xff]  }
 0x4cb   : > { %v1217_v50 = vmax.f32 %v1167_v46, 0.0  ;;  %v1219_v39 = vmax.f32 %v1210_v62, 0.0  ;;  %v1171_v61 = vadd.f32 %v1170_v29, %v957_v44  ;;  %v1214_v22 = vadd.f32 %v1213_v37, %v965_v55  ;;  %v3081_v48 = vld [vmem:[%s3486_s5 + $0x380] ss:$16 sps:$4 sm:$0xff]   ;;  %1887 = vmatprep.subr.bf16.mxu1 %v3086_v45  ;;  %v3092_v52 = vld [vmem:[%s3486_s5 + $0x3ac] ss:$16 sps:$4 sm:$0xff]  }
 0x4cc   : > { %v1220_v9 = vmax.f32 %v1169_v7, 0.0  ;;  %v1222_v19 = vmax.f32 %v1212_v10, 0.0  ;;  %v3328_v46 = vmov 9   ;;  %v3095_v55 = vld [vmem:[%s3486_s5 + $0x3c4] ss:$16 sps:$4 sm:$0xff]  }
 0x4cd   : > { %v1221_v27 = vmax.f32 %v1171_v61, 0.0  ;;  %v1223_v30 = vmax.f32 %v1214_v22, 0.0  ;;  %v3101_v62 = vld [vmem:[%s3486_s5 + $0x3e4] ss:$16 sps:$4 sm:$0xff]   ;;  %v3116_v7 = vld [vmem:[%s3486_s5 + $0x42c] ss:$16 sps:$4 sm:$0xff]  }
 0x4ce   : > { %v3111_v61 = vld [vmem:[%s3486_s5 + $0x420] ss:$16 sps:$4 sm:$0xff]   ;;  %v3120_v10 = vld [vmem:[%s3486_s5 + $0x448] ss:$16 sps:$4 sm:$0xff]  }
 0x50d   : > { %v1238_v53 = vpop.permute.xlu1 %1237  ;;  %v1227_v54 = vpop.permute.xlu0 %1226 }
 0x50e   : > { %v1244_v43 = vmul.f32 %v1238_v53, %v1217_v50  ;;  %v1234_v57 = vmul.f32 %v1227_v54, %v1216_v49  ;;  %v3084_v49 = vld [vmem:[%s3486_s5 + $0x388] ss:$16 sps:$4 sm:$0xff]   ;;  %v3089_v50 = vld [vmem:[%s3486_s5 + $0x3a4] ss:$16 sps:$4 sm:$0xff]   ;;  %v3329_v53 = vmov 10  }
 0x510   : > { %v1246_v58 = vadd.f32 %v1244_v43, %v1234_v57  ;;  %v3098_v43 = vld [vmem:[%s3486_s5 + $0x3cc] ss:$16 sps:$4 sm:$0xff]   ;;  %v3093_v57 = vld [vmem:[%s3486_s5 + $0x3c0] ss:$16 sps:$4 sm:$0xff]  }
 0x511   : > { %v514_v60 = vpop.permute.xlu0 %513 }
 0x512   : > { %v1250_v13 = vpop.permute.xlu1 %1249  ;;  %v520_v15 = vsel %vm442_vm2, %v514_v60, 0.0 }
 0x513   : > { %v1256_v63 = vmul.f32 %v1250_v13, %v1218_v59  ;;  %521 = vadd.xlane.f32.xlu0 %v520_v15  ;;  %v3330_v59 = vmov 11   ;;  %v3104_v13 = vld [vmem:[%s3486_s5 + $0x3ec] ss:$16 sps:$4 sm:$0xff]  }
 0x515   : > { %v1258_v2 = vadd.f32 %v1256_v63, %v1246_v58  ;;  %v3096_v58 = vld [vmem:[%s3486_s5 + $0x3c8] ss:$16 sps:$4 sm:$0xff]   ;;  %v3099_v63 = vld [vmem:[%s3486_s5 + $0x3e0] ss:$16 sps:$4 sm:$0xff]  }
 0x517   : > { %v1262_v4 = vpop.permute.xlu1 %1261  ;;  %529 = vmax.xlane.f32.xlu0 %v528_v3 }
 0x518   : > { %v1268_v26 = vmul.f32 %v1262_v4, %v1219_v39  ;;  %v3110_v4 = vld [vmem:[%s3486_s5 + $0x40c] ss:$16 sps:$4 sm:$0xff]  }
 0x51a   : > { %v1270_v5 = vadd.f32 %v1268_v26, %v1258_v2  ;;  %v3102_v2 = vld [vmem:[%s3486_s5 + $0x3e8] ss:$16 sps:$4 sm:$0xff]   ;;  %v3105_v26 = vld [vmem:[%s3486_s5 + $0x400] ss:$16 sps:$4 sm:$0xff]  }
 0x51b   : > { %532 = vmax.xlane.f32.xlu0 %v531_v6 }
 0x51c   : > { %v1232_v8 = vpop.permute.xlu1 %1231 }
 0x51d   : > { %v1235_v12 = vmul.f32 %v1232_v8, %v1220_v9  ;;  %v3114_v8 = vld [vmem:[%s3486_s5 + $0x428] ss:$16 sps:$4 sm:$0xff]   ;;  %v3117_v9 = vld [vmem:[%s3486_s5 + $0x440] ss:$16 sps:$4 sm:$0xff]  }
 0x521   : > { %v1242_v11 = vpop.permute.xlu1 %1241 }
 0x522   : > { %v1245_v14 = vmul.f32 %v1242_v11, %v1221_v27  ;;  %v3119_v27 = vld [vmem:[%s3486_s5 + $0x444] ss:$16 sps:$4 sm:$0xff]   ;;  %v3122_v11 = vld [vmem:[%s3486_s5 + $0x44c] ss:$16 sps:$4 sm:$0xff]  }
 0x524   : > { %v1247_v17 = vadd.f32 %v1245_v14, %v1235_v12  ;;  %v3125_v12 = vld [vmem:[%s3486_s5 + $0x464] ss:$16 sps:$4 sm:$0xff]   ;;  %v3128_v14 = vld [vmem:[%s3486_s5 + $0x46c] ss:$16 sps:$4 sm:$0xff]  }
 0x526   : > { %v1254_v23 = vpop.permute.xlu1 %1253 }
 0x527   : > { %v1257_v24 = vmul.f32 %v1254_v23, %v1222_v19  ;;  %v3126_v19 = vld [vmem:[%s3486_s5 + $0x468] ss:$16 sps:$4 sm:$0xff]  }
 0x529   : > { %v1259_v25 = vadd.f32 %v1257_v24, %v1247_v17  ;;  %v3123_v17 = vld [vmem:[%s3486_s5 + $0x460] ss:$16 sps:$4 sm:$0xff]  }
 0x52b   : > { %v1266_v31 = vpop.permute.xlu1 %1265 }
 0x52c   : > { %v1269_v32 = vmul.f32 %v1266_v31, %v1223_v30 }
 0x52e   : > { %v1271_v18 = vadd.f32 %v1269_v32, %v1259_v25 }
 0x52f   : > { %v512_v20 = vpop.permute.xlu1 %511 }
 0x530   : > { %v1305_v35 = vpack.c.bf16 %v1271_v18, %v1270_v5  ;;  %v517_v36 = vsel %vm442_vm2, %v512_v20, 0.0  ;;  %v3108_v5 = vld [vmem:[%s3486_s5 + $0x408] ss:$16 sps:$4 sm:$0xff]  }
 0x531   : > { %518 = vadd.xlane.f32.xlu1 %v517_v36 }
 0x532   : > { %1520 = vmatmul.mubr.bf16.vlgmr.msra.gmra.mrb[12].mxu0 %v1305_v35  ;;  %1563 = vmatmul.mubr.bf16.vlgmr.msra.gmra.mrb[12].mxu1 %v1305_v35  ;;  %v1304_v35 = vld [vmem:[%s3492_s8 + $0xa] sm:$0xf] }
 0x533   : > { %1876 = vmatprep.mubr.bf16.mxu0 %v3315_v0  ;;  %1919 = vmatprep.mubr.bf16.mxu1 %v3315_v0  ;;  %v3083_v0 = vld [vmem:[%s3486_s5 + $0x384] ss:$16 sps:$4 sm:$0xff]   ;;  %v1310_v36 = vrot.slane %v1304_v35, %v3553_v40 }
 0x534   : > { %1844 = vmatprep.subr.bf16.mxu0 %v3083_v0  ;;  %1888 = vmatpush1.bf16.msra.mxu1 %v3084_v49 }
 0x535   : > { %1845 = vmatpush1.bf16.msra.mxu0 %v3081_v48  ;;  %1889 = vmatprep.subr.bf16.mxu1 %v3092_v52  ;;  %v1322_v48 = vrot.slane %v1304_v35, %v3665_v51 }
 0x536   : > { %1846 = vmatprep.subr.bf16.mxu0 %v3089_v50 }
 0x5a0   : > { %v522_v28 = vpop.xlane.xlu0 %521 }
 0x5a1   : > { %3157 = vrcp.f32 %v522_v28  ;;  %v1314_v28 = vrot.slane %v1304_v35, %v3557_v42 }
 0x5a4   : > { %v530_v54 = vpop.xlane.xlu0 %529 }
 0x5a5   : > { %v534_v60 = vsub.f32 %v3584_v16, %v530_v54  ;;  %v3107_v16 = vld [vmem:[%s3486_s5 + $0x404] ss:$16 sps:$4 sm:$0xff]  }
 0x5a7   : > { %v536_v39 = vmul.f32 1.442695, %v534_v60 }
 0x5a8   : > { %v533_v15 = vpop.xlane.xlu0 %532 }
 0x5a9   : > { %v535_v3 = vsub.f32 %v3590_v21, %v533_v15  ;;  %v3113_v21 = vld [vmem:[%s3486_s5 + $0x424] ss:$16 sps:$4 sm:$0xff]  }
 0x5ab   : > { %v3158_v29 = vpop.eup %3157  ;;  %v538_v6 = vmul.f32 1.442695, %v535_v3 }
 0x5ac   : > { %v3738_v37 = vmul.f32 %v3158_v29, %v3688_v56  ;;  %v3087_v56 = vld [vmem:[%s3486_s5 + $0x3a0] ss:$16 sps:$4 sm:$0xff]  }
 0x5ad   : > { %1847 = vmatpush1.bf16.msra.mxu0 %v3087_v56 }
 0x5ae   : > { %1588 = vperm.xlu0 %2901, %v3738_v37   ;;  %1848 = vmatprep.subr.bf16.mxu0 %v3095_v55 }
 0x5b1   : > { %1849 = vmatpush1.bf16.msra.mxu0 %v3093_v57 }
 0x5b2   : > { %1850 = vmatprep.subr.bf16.mxu0 %v3101_v62 }
 0x5b5   : > { %1851 = vmatpush1.bf16.msra.mxu0 %v3099_v63 }
 0x5b6   : > { %1852 = vmatprep.subr.bf16.mxu0 %v3107_v16 }
 0x5b9   : > { %1853 = vmatpush1.bf16.msra.mxu0 %v3105_v26 }
 0x5ba   : > { %1854 = vmatprep.subr.bf16.mxu0 %v3113_v21 }
 0x5bd   : > { %1855 = vmatpush1.bf16.msra.mxu0 %v3111_v61 }
 0x5be   : > { %v519_v38 = vpop.xlane.xlu1 %518  ;;  %1856 = vmatprep.subr.bf16.mxu0 %v3119_v27 }
 0x5bf   : > { %3159 = vrcp.f32 %v519_v38 }
 0x5c0   : > { %3161 = vpow2.f32 %v536_v39 }
 0x5c1   : > { %3163 = vpow2.f32 %v538_v6  ;;  %1857 = vmatpush1.bf16.msra.mxu0 %v3117_v9 }
 0x5c2   : > { %1858 = vmatprep.subr.bf16.mxu0 %v3125_v12 }
 0x5c5   : > { %1859 = vmatpush1.bf16.msra.mxu0 %v3123_v17 }
 0x5c6   : > { %2765 = vmatprep.subr.bf16.mxu0 %v3316_v1 }
 0x5c9   : > { %v3160_v41 = vpop.eup %3159 }
 0x5ca   : > { %v524_v44 = vmul.f32 %v3160_v41, %v3722_v33  ;;  %v3090_v33 = vld [vmem:[%s3486_s5 + $0x3a8] ss:$16 sps:$4 sm:$0xff]   ;;  %v3779_v22 = vpop.eup %3161  ;;  %v1318_v41 = vrot.slane %v1304_v35, %v3659_v47  ;;  %v3130_v35 = vld [vmem:[%s3486_s5 + $0x4a4] ss:$16 sps:$4 sm:$0xff]  }
 0x5cb   : > { %1890 = vmatpush1.bf16.msra.mxu1 %v3090_v33  ;;  %v3783_v23 = vpop.eup %3163 }
 0x5cc   : > { %1583 = vperm.xlu1 %2900, %v524_v44   ;;  %1891 = vmatprep.subr.bf16.mxu1 %v3098_v43 }
 0x5cf   : > { %1892 = vmatpush1.bf16.msra.mxu1 %v3096_v58 }
 0x5d0   : > { %2902 = vset.pattern.permute.xlu1 %v3328_v46  ;;  %1893 = vmatprep.subr.bf16.mxu1 %v3104_v13 }
 0x5d1   : > { %1594 = vperm.xlu1 %2902, %v524_v44  }
 0x5d3   : > { %1894 = vmatpush1.bf16.msra.mxu1 %v3102_v2 }
 0x5d4   : > { %1895 = vmatprep.subr.bf16.mxu1 %v3110_v4 }
 0x5d5   : > { %2903 = vset.pattern.permute.xlu1 %v3329_v53 }
 0x5d6   : > { %1606 = vperm.xlu1 %2903, %v524_v44  }
 0x5d7   : > { %1896 = vmatpush1.bf16.msra.mxu1 %v3108_v5 }
 0x5d8   : > { %1897 = vmatprep.subr.bf16.mxu1 %v3116_v7 }
 0x5da   : > { %2904 = vset.pattern.permute.xlu1 %v3330_v59 }
 0x5db   : > { %1618 = vperm.xlu1 %2904, %v524_v44   ;;  %1898 = vmatpush1.bf16.msra.mxu1 %v3114_v8 }
 0x5dc   : > { %1899 = vmatprep.subr.bf16.mxu1 %v3122_v11 }
 0x5df   : > { %2905 = vset.pattern.permute.xlu1 %v3328_v46  ;;  %1900 = vmatpush1.bf16.msra.mxu1 %v3120_v10 }
 0x5e0   : > { %1598 = vperm.xlu1 %2905, %v3738_v37   ;;  %1901 = vmatprep.subr.bf16.mxu1 %v3128_v14 }
 0x5e3   : > { %1902 = vmatpush1.bf16.msra.mxu1 %v3126_v19  ;;  %v3332_v19 = vmov 13  }
 0x5e4   : > { %2906 = vset.pattern.permute.xlu1 %v3329_v53 }
 0x5e5   : > { %1610 = vperm.xlu1 %2906, %v3738_v37  }
 0x5e9   : > { %2907 = vset.pattern.permute.xlu1 %v3330_v59 }
 0x5ea   : > { %1622 = vperm.xlu1 %2907, %v3738_v37  }
 0x5ee   : > { %542 = vrot.lane.b32.xlu1 %v3779_v22, %s3331_s15 }
 0x5ef   : > { %2909 = vset.pattern.permute.xlu1 %v3332_v19 }
 0x5f2   : > { %544 = vrot.lane.b32.xlu1 %v3783_v23, %s3331_s15 }
 0x605   : > { %v1521_v24 = vpop.f32.mrb[12].mxu0  ;;  %v1564_v25 = vpop.f32.mrb[12].mxu1 }
 0x606   : > { %v1523_v30 = vpop.f32.mrb[13].mxu0  ;;  %v1566_v31 = vpop.f32.mrb[13].mxu1  ;;  %v1522_v29 = vadd.f32 %v1521_v24, %v1310_v36  ;;  %v1565_v45 = vadd.f32 %v1564_v25, %v1318_v41  ;;  %v3333_v24 = vmov 12  }
 0x607   : > { %v1525_v32 = vpop.f32.mrb[14].mxu0  ;;  %v1568_v18 = vpop.f32.mrb[14].mxu1  ;;  %v1524_v37 = vadd.f32 %v1523_v30, %v1314_v28  ;;  %v1567_v52 = vadd.f32 %v1566_v31, %v1322_v48  ;;  %2908 = vset.pattern.permute.xlu0 %v3333_v24 }
 0x608   : > { %v1527_v34 = vpop.f32.mrb[15].mxu0  ;;  %v1570_v20 = vpop.f32.mrb[15].mxu1  ;;  %v1573_v44 = vmax.f32 %v1522_v29, 0.0  ;;  %v1575_v33 = vmax.f32 %v1565_v45, 0.0  ;;  %v1526_v57 = vadd.f32 %v1525_v32, %v1310_v36  ;;  %v1569_v2 = vadd.f32 %v1568_v18, %v1318_v41  ;;  %v3132_v29 = vld [vmem:[%s3486_s5 + $0x4e4] ss:$16 sps:$4 sm:$0xff]  }
 0x609   : > { %v1574_v0 = vmax.f32 %v1524_v37, 0.0  ;;  %v1576_v43 = vmax.f32 %v1567_v52, 0.0  ;;  %v1528_v58 = vadd.f32 %v1527_v34, %v1314_v28  ;;  %v1571_v5 = vadd.f32 %v1570_v20, %v1322_v48  ;;  %v3129_v34 = vld [vmem:[%s3486_s5 + $0x484] ss:$16 sps:$4 sm:$0xff]  }
 0x60a   : > { %v1577_v15 = vmax.f32 %v1526_v57, 0.0  ;;  %v1579_v26 = vmax.f32 %v1569_v2, 0.0  ;;  %v3334_v18 = vmov 14   ;;  %v3335_v20 = vmov 15   ;;  %v3133_v37 = vld [vmem:[%s3486_s5 + $0x504] ss:$16 sps:$4 sm:$0xff]  }
 0x60b   : > { %v1578_v63 = vmax.f32 %v1528_v58, 0.0  ;;  %v1580_v61 = vmax.f32 %v1571_v5, 0.0  ;;  %v3136_v41 = vld [vmem:[%s3486_s5 + $0x564] ss:$16 sps:$4 sm:$0xff]  }
 0x62d   : > { %v1589_v62 = vpop.permute.xlu0 %1588 }
 0x62e   : > { %v1592_v3 = vmul.f32 %v1589_v62, %v1577_v15 }
 0x64b   : > { %v1584_v38 = vpop.permute.xlu1 %1583 }
 0x64c   : > { %v1591_v49 = vmul.f32 %v1584_v38, %v1573_v44  ;;  %v3134_v38 = vld [vmem:[%s3486_s5 + $0x524] ss:$16 sps:$4 sm:$0xff]  }
 0x650   : > { %v1595_v46 = vpop.permute.xlu1 %1594 }
 0x651   : > { %v1601_v56 = vmul.f32 %v1595_v46, %v1574_v0 }
 0x653   : > { %v1603_v50 = vadd.f32 %v1601_v56, %v1591_v49 }
 0x655   : > { %v1607_v53 = vpop.permute.xlu1 %1606 }
 0x656   : > { %v1613_v54 = vmul.f32 %v1607_v53, %v1575_v33  ;;  %v1661_v33 = vld [vmem:[%s3492_s8 + $0xe] sm:$0xf] }
 0x657   : > { %v1667_v52 = vrot.slane %v1661_v33, %v3553_v40  ;;  %v1671_v53 = vrot.slane %v1661_v33, %v3557_v42  ;;  %v1679_v62 = vrot.slane %v1661_v33, %v3665_v51 }
 0x658   : > { %v1615_v55 = vadd.f32 %v1613_v54, %v1603_v50 }
 0x65a   : > { %v1619_v59 = vpop.permute.xlu1 %1618 }
 0x65b   : > { %v1625_v60 = vmul.f32 %v1619_v59, %v1576_v43  ;;  %v1675_v43 = vrot.slane %v1661_v33, %v3659_v47 }
 0x65d   : > { %v1627_v13 = vadd.f32 %v1625_v60, %v1615_v55 }
 0x65f   : > { %v1599_v39 = vpop.permute.xlu1 %1598 }
 0x660   : > { %v1602_v16 = vmul.f32 %v1599_v39, %v1578_v63 }
 0x662   : > { %v1604_v4 = vadd.f32 %v1602_v16, %v1592_v3 }
 0x664   : > { %v1611_v6 = vpop.permute.xlu1 %1610 }
 0x665   : > { %v1614_v21 = vmul.f32 %v1611_v6, %v1579_v26 }
 0x667   : > { %v1616_v7 = vadd.f32 %v1614_v21, %v1604_v4 }
 0x669   : > { %v1623_v8 = vpop.permute.xlu1 %1622 }
 0x66a   : > { %v1626_v9 = vmul.f32 %v1623_v8, %v1580_v61 }
 0x66c   : > { %v1628_v27 = vadd.f32 %v1626_v9, %v1616_v7 }
 0x66d   : > { %v543_v10 = vpop.permute.xlu1 %542 }
 0x66e   : > { %v1662_v11 = vpack.c.bf16 %v1628_v27, %v1627_v13  ;;  %v548_v12 = vsel %vm442_vm2, %v543_v10, 0.0 }
 0x66f   : > { %549 = vadd.xlane.f32.xlu0 %v548_v12 }
 0x670   : > { %1877 = vmatmul.mubr.bf16.vlgmr.msra.gmra.mrb[16].mxu0 %v1662_v11  ;;  %1920 = vmatmul.mubr.bf16.vlgmr.msra.gmra.mrb[16].mxu1 %v1662_v11 }
 0x671   : > { %v545_v14 = vpop.permute.xlu1 %544  ;;  %2781 = vmatprep.mubr.msk.bf16.mxu0 %vm3317_vm1, %v3316_v1  ;;  %2766 = vmatpush3.bf16.msra.mxu0 %v3129_v34 }
 0x672   : > { %v551_v17 = vsel %vm442_vm2, %v545_v14, 0.0  ;;  %2767 = vmatprep.subr.bf16.mxu0 %v3316_v1 }
 0x673   : > { %552 = vadd.xlane.f32.xlu1 %v551_v17 }
 0x675   : > { %2768 = vmatpush3.bf16.msra.mxu0 %v3130_v35 }
 0x676   : > { %2769 = vmatprep.subr.bf16.mxu0 %v3316_v1 }
 0x6fc   : > { %v550_v25 = vpop.xlane.xlu0 %549 }
 0x6fd   : > { %3165 = vrcp.f32 %v550_v25 }
 0x700   : > { %v553_v31 = vpop.xlane.xlu1 %552 }
 0x701   : > { %3167 = vrcp.f32 %v553_v31 }
 0x707   : > { %v3166_v30 = vpop.eup %3165 }
 0x708   : > { %v555_v32 = vmul.f32 %v3166_v30, %v3779_v22  ;;  %v3131_v22 = vld [vmem:[%s3486_s5 + $0x4c4] ss:$16 sps:$4 sm:$0xff]  }
 0x709   : > { %2770 = vmatpush3.bf16.msra.mxu0 %v3131_v22 }
 0x70a   : > { %1951 = vperm.xlu1 %2909, %v555_v32   ;;  %1940 = vperm.xlu0 %2908, %v555_v32  }
 0x70b   : > { %v3168_v36 = vpop.eup %3167  ;;  %2771 = vmatprep.subr.bf16.mxu0 %v3316_v1 }
 0x70c   : > { %v557_v28 = vmul.f32 %v3168_v36, %v3783_v23  ;;  %v3135_v23 = vld [vmem:[%s3486_s5 + $0x544] ss:$16 sps:$4 sm:$0xff]  }
 0x70d   : > { %2772 = vmatpush3.bf16.msra.mxu0 %v3132_v29 }
 0x70e   : > { %2910 = vset.pattern.permute.xlu1 %v3334_v18  ;;  %2916 = vset.pattern.permute.xlu0 %v3335_v20 }
 0x70f   : > { %1963 = vperm.xlu1 %2910, %v555_v32   ;;  %2773 = vmatprep.subr.bf16.mxu0 %v3316_v1 }
 0x711   : > { %2774 = vmatpush3.bf16.msra.mxu0 %v3133_v37 }
 0x712   : > { %2775 = vmatprep.subr.bf16.mxu0 %v3316_v1 }
 0x713   : > { %2911 = vset.pattern.permute.xlu1 %v3335_v20 }
 0x714   : > { %1975 = vperm.xlu1 %2911, %v555_v32  }
 0x715   : > { %2776 = vmatpush3.bf16.msra.mxu0 %v3134_v38  ;;  %v3336_v38 = vmov (!%p2688_p7), 0.0  }
 0x716   : > { %2777 = vmatprep.subr.bf16.mxu0 %v3316_v1  ;;  %2103 = vst [vmem:[%s3918_s3] sm:$0xff] (!%p2688_p7), %v3336_v38  ;;  %2104 = vst [vmem:[%s3918_s3 + $0x8] sm:$0xff] (!%p2688_p7), %v3336_v38 }
 0x718   : > { %2912 = vset.pattern.permute.xlu1 %v3333_v24 }
 0x719   : > { %1945 = vperm.xlu1 %2912, %v557_v28   ;;  %2778 = vmatpush3.bf16.msra.mxu0 %v3135_v23 }
 0x71a   : > { %2779 = vmatprep.subr.bf16.mxu0 %v3316_v1 }
 0x71d   : > { %2913 = vset.pattern.permute.xlu1 %v3332_v19  ;;  %2780 = vmatpush3.bf16.msra.mxu0 %v3136_v41 }
 0x71e   : > { %1955 = vperm.xlu1 %2913, %v557_v28  }
 0x722   : > { %2914 = vset.pattern.permute.xlu1 %v3334_v18 }
 0x723   : > { %1967 = vperm.xlu1 %2914, %v557_v28  }
 0x727   : > { %2915 = vset.pattern.permute.xlu1 %v3335_v20  ;;  %v2679_v20 = vld [vmem:[%s3492_s8 + $0x13] ss:$0 sm:$0xff] }
 0x728   : > { %1979 = vperm.xlu1 %2915, %v557_v28  }
 0x743   : > { %v1878_v44 = vpop.f32.mrb[16].mxu0  ;;  %v1921_v0 = vpop.f32.mrb[16].mxu1 }
 0x744   : > { %v1880_v45 = vpop.f32.mrb[17].mxu0  ;;  %v1923_v46 = vpop.f32.mrb[17].mxu1  ;;  %v1879_v54 = vadd.f32 %v1878_v44, %v1667_v52  ;;  %v1922_v58 = vadd.f32 %v1921_v0, %v1675_v43 }
 0x745   : > { %v1882_v48 = vpop.f32.mrb[18].mxu0  ;;  %v1925_v49 = vpop.f32.mrb[18].mxu1  ;;  %v1881_v55 = vadd.f32 %v1880_v45, %v1671_v53  ;;  %v1924_v39 = vadd.f32 %v1923_v46, %v1679_v62 }
 0x746   : > { %v1884_v56 = vpop.f32.mrb[19].mxu0  ;;  %v1927_v50 = vpop.f32.mrb[19].mxu1  ;;  %v1930_v1 = vmax.f32 %v1879_v54, 0.0  ;;  %v1932_v2 = vmax.f32 %v1922_v58, 0.0  ;;  %v1883_v47 = vadd.f32 %v1882_v48, %v1667_v52  ;;  %v1926_v27 = vadd.f32 %v1925_v49, %v1675_v43 }
 0x747   : > { %v1931_v57 = vmax.f32 %v1881_v55, 0.0  ;;  %v1933_v26 = vmax.f32 %v1924_v39, 0.0  ;;  %v1885_v7 = vadd.f32 %v1884_v56, %v1671_v53  ;;  %v1928_v17 = vadd.f32 %v1927_v50, %v1679_v62 }
 0x748   : > { %v1934_v8 = vmax.f32 %v1883_v47, 0.0  ;;  %v1936_v14 = vmax.f32 %v1926_v27, 0.0 }
 0x749   : > { %v1935_v9 = vmax.f32 %v1885_v7, 0.0  ;;  %v1937_v30 = vmax.f32 %v1928_v17, 0.0 }
 0x789   : > { %v1952_v59 = vpop.permute.xlu1 %1951  ;;  %v1941_v60 = vpop.permute.xlu0 %1940 }
 0x78a   : > { %v1958_v13 = vmul.f32 %v1952_v59, %v1931_v57  ;;  %v1948_v15 = vmul.f32 %v1941_v60, %v1930_v1 }
 0x78c   : > { %v1960_v63 = vadd.f32 %v1958_v13, %v1948_v15 }
 0x78e   : > { %v1964_v3 = vpop.permute.xlu1 %1963 }
 0x78f   : > { %v1970_v16 = vmul.f32 %v1964_v3, %v1932_v2 }
 0x791   : > { %v1972_v4 = vadd.f32 %v1970_v16, %v1960_v63 }
 0x793   : > { %v1976_v5 = vpop.permute.xlu1 %1975 }
 0x794   : > { %v1982_v6 = vmul.f32 %v1976_v5, %v1933_v26 }
 0x796   : > { %v1984_v21 = vadd.f32 %v1982_v6, %v1972_v4 }
 0x798   : > { %v1946_v61 = vpop.permute.xlu1 %1945 }
 0x799   : > { %v1949_v10 = vmul.f32 %v1946_v61, %v1934_v8 }
 0x79d   : > { %v1956_v51 = vpop.permute.xlu1 %1955 }
 0x79e   : > { %v1959_v11 = vmul.f32 %v1956_v51, %v1935_v9 }
 0x7a0   : > { %v1961_v12 = vadd.f32 %v1959_v11, %v1949_v10 }
 0x7a2   : > { %v1968_v19 = vpop.permute.xlu1 %1967 }
 0x7a3   : > { %v1971_v24 = vmul.f32 %v1968_v19, %v1936_v14 }
 0x7a5   : > { %v1973_v25 = vadd.f32 %v1971_v24, %v1961_v12 }
 0x7a7   : > { %v1980_v31 = vpop.permute.xlu1 %1979 }
 0x7a8   : > { %v1983_v32 = vmul.f32 %v1980_v31, %v1937_v30 }
 0x7aa   : > { %v1985_v18 = vadd.f32 %v1983_v32, %v1973_v25 }
 0x7ac   : > { %v2002_v34 = vpack.c.bf16 %v1985_v18, %v1984_v21 }
 0x7ae   : > { %2782 = vmatmul.mubr.bf16.vlgmr.msra.gmra.mrb[20].mxu0 %v2002_v34 }
 0x87e   : > { %2102 = sbr.rel (%p2688_p7) target bundleno = 2181 (0x885), region = 44 }
 0x881   : > { %v2092_v35 = vpop.f32.mrb[20].mxu0 }
 0x882   : > { %v3818_v36 = vadd.f32 %v2679_v20, %v2092_v35  ;;  %v2783_v22 = vpop.f32.mrb[21].mxu0 }
 0x883   : > { %v2095_v28 = vpop.f32.mrb[22].mxu0 }
 0x884   : > { %v3820_v29 = vadd.f32 %v2679_v20, %v2095_v28  ;;  %v2784_v37 = vpop.f32.mrb[23].mxu0 }
 0x885 PF: > { %p2689_p8 = scmp.ge.s32.totalorder %s3381_s16, 1 }
 0x886   : > { %v3171_v23 = vld [vmem:[%s3486_s5 + $0x48c] ss:$16 sps:$4 sm:$0xff] (!%p2689_p8)   ;;  %v3173_v41 = vld [vmem:[%s3486_s5 + $0x488] ss:$16 sps:$4 sm:$0xff] (!%p2689_p8)   ;;  %v3337_v44 = vmov (!%p2689_p8), 0   ;;  %v3338_v45 = vmov (!%p2689_p8), 0.0   ;;  %v2125_v39 = vpack.c.bf16 (!%p2689_p8), %v3820_v29, %v3818_v36 }
 0x887   : > { %2108 = sbr.rel (%p2689_p8) target bundleno = 2807 (0xaf7), region = 48  ;;  %2250 = vmatprep.mubr.bf16.mxu0 (!%p2689_p8), %v3337_v44  ;;  %3170 = vset.pattern.permute.xlu1 (!%p2689_p8), %v3337_v44  ;;  %v3174_v0 = vld [vmem:[%s3486_s5 + $0x4ac] ss:$16 sps:$4 sm:$0xff] (!%p2689_p8)   ;;  %v3176_v46 = vld [vmem:[%s3486_s5 + $0x4a8] ss:$16 sps:$4 sm:$0xff] (!%p2689_p8)   ;;  %s3339_s22 = smov (!%p2689_p8), 112  }
 0x888   : > { %2218 = vmatprep.subr.bf16.mxu0 (!%p2689_p8), %v3171_v23  ;;  %2785 = vmatprep.subr.bf16.mxu1 (!%p2689_p8), %v3338_v45  ;;  %v3177_v48 = vld [vmem:[%s3486_s5 + $0x4cc] ss:$16 sps:$4 sm:$0xff] (!%p2689_p8)   ;;  %v3179_v49 = vld [vmem:[%s3486_s5 + $0x4c8] ss:$16 sps:$4 sm:$0xff] (!%p2689_p8)   ;;  %v3195_v52 = vld [vmem:[%s3486_s5 + $0x480] ss:$16 sps:$4 sm:$0xff] (!%p2689_p8)  }
 0x889   : > { %2219 = vmatpush1.bf16.msra.mxu0 (!%p2689_p8), %v3173_v41  ;;  %3169 = vset.pattern.permute.xlu0 (!%p2689_p8), %v3337_v44  ;;  %v3180_v56 = vld [vmem:[%s3486_s5 + $0x4ec] ss:$16 sps:$4 sm:$0xff] (!%p2689_p8)   ;;  %v3182_v50 = vld [vmem:[%s3486_s5 + $0x4e8] ss:$16 sps:$4 sm:$0xff] (!%p2689_p8)   ;;  %v3196_v53 = vld [vmem:[%s3486_s5 + $0x4a0] ss:$16 sps:$4 sm:$0xff] (!%p2689_p8)  }
 0x88a   : > { %2220 = vmatprep.subr.bf16.mxu0 (!%p2689_p8), %v3174_v0  ;;  %v3183_v33 = vld [vmem:[%s3486_s5 + $0x50c] ss:$16 sps:$4 sm:$0xff] (!%p2689_p8)   ;;  %2327 = vrot.lane.b32.xlu0 (!%p2689_p8), %v3195_v52, %s3339_s22  ;;  %v3197_v54 = vld [vmem:[%s3486_s5 + $0x4c0] ss:$16 sps:$4 sm:$0xff] (!%p2689_p8)   ;;  %v3185_v55 = vld [vmem:[%s3486_s5 + $0x508] ss:$16 sps:$4 sm:$0xff] (!%p2689_p8)  }
 0x88b   : > { %2331 = vrot.lane.b32.xlu1 (!%p2689_p8), %v3197_v54, %s3339_s22  ;;  %v3198_v43 = vld [vmem:[%s3486_s5 + $0x4e0] ss:$16 sps:$4 sm:$0xff] (!%p2689_p8)   ;;  %v3186_v1 = vld [vmem:[%s3486_s5 + $0x52c] ss:$16 sps:$4 sm:$0xff] (!%p2689_p8)   ;;  %v3188_v58 = vld [vmem:[%s3486_s5 + $0x528] ss:$16 sps:$4 sm:$0xff] (!%p2689_p8)  }
 0x88c   : > { %v3199_v57 = vld [vmem:[%s3486_s5 + $0x500] ss:$16 sps:$4 sm:$0xff] (!%p2689_p8)   ;;  %v3189_v60 = vld [vmem:[%s3486_s5 + $0x54c] ss:$16 sps:$4 sm:$0xff] (!%p2689_p8)   ;;  %v3191_v13 = vld [vmem:[%s3486_s5 + $0x548] ss:$16 sps:$4 sm:$0xff] (!%p2689_p8)  }
 0x88d   : > { %2221 = vmatpush1.bf16.msra.mxu0 (!%p2689_p8), %v3176_v46  ;;  %v3200_v59 = vld [vmem:[%s3486_s5 + $0x520] ss:$16 sps:$4 sm:$0xff] (!%p2689_p8)   ;;  %v3192_v63 = vld [vmem:[%s3486_s5 + $0x56c] ss:$16 sps:$4 sm:$0xff] (!%p2689_p8)   ;;  %v3194_v2 = vld [vmem:[%s3486_s5 + $0x568] ss:$16 sps:$4 sm:$0xff] (!%p2689_p8)  }
 0x88e   : > { %2222 = vmatprep.subr.bf16.mxu0 %v3177_v48  ;;  %2329 = vrot.lane.b32.xlu0 %v3196_v53, %s3339_s22  ;;  %v3201_v62 = vld [vmem:[%s3486_s5 + $0x540] ss:$16 sps:$4 sm:$0xff]   ;;  %vm3340_vm6 = vmmov 0   ;;  %v2126_v7 = vld [vmem:[%s3492_s8 + $0x14] sm:$0x3]  ;;  %vm2392_vm7 = vcmask 64512  }
 0x88f   : > { %2333 = vrot.lane.b32.xlu1 %v3198_v43, %s3339_s22  ;;  %v3202_v15 = vld [vmem:[%s3486_s5 + $0x560] ss:$16 sps:$4 sm:$0xff]   ;;  %2801 = vmatprep.mubr.msk.bf16.mxu1 %vm3340_vm6, %v3338_v45  ;;  %v2131_v61 = vrot.slane %v2126_v7, %v3553_v40  ;;  %v2706_v19 = vld [vmem:[%s3492_s8 + $0x16] ss:$0 sm:$0xff]  ;;  %v2135_v20 = vrot.slane %v2126_v7, %v3557_v42  ;;  %p3927_p5 = scmp.eq.s32.totalorder %s3381_s16, 0 }
 0x890   : > { %v2417_v0 = vld [vmem:[%s3918_s3 + $0x8] sm:$0xff]  ;;  %v2416_v42 = vld [vmem:[%s3918_s3] sm:$0xff] }
 0x891   : > { %2223 = vmatpush1.bf16.msra.mxu0 %v3179_v49  ;;  %s2420_s18 = scalar_select %p3927_p5, 1, 0 }
 0x892   : > { %2224 = vmatprep.subr.bf16.mxu0 %v3180_v56  ;;  %2335 = vrot.lane.b32.xlu0 %v3199_v57, %s3339_s22 }
 0x893   : > { %2337 = vrot.lane.b32.xlu1 %v3200_v59, %s3339_s22  ;;  %v2421_v44 = vstv %s2420_s18 }
 0x894   : > { %vm2422_vm8 = vcmp.eq.s32.totalorder %v2421_v44, 1 }
 0x895   : > { %2225 = vmatpush1.bf16.msra.mxu0 %v3182_v50 }
 0x896   : > { %2226 = vmatprep.subr.bf16.mxu0 %v3183_v33  ;;  %2339 = vrot.lane.b32.xlu0 %v3201_v62, %s3339_s22 }
 0x897   : > { %2341 = vrot.lane.b32.xlu1 %v3202_v15, %s3339_s22 }
 0x899   : > { %2227 = vmatpush1.bf16.msra.mxu0 %v3185_v55 }
 0x89a   : > { %2228 = vmatprep.subr.bf16.mxu0 %v3186_v1 }
 0x89d   : > { %2229 = vmatpush1.bf16.msra.mxu0 %v3188_v58 }
 0x89e   : > { %2230 = vmatprep.subr.bf16.mxu0 %v3189_v60 }
 0x8a1   : > { %2231 = vmatpush1.bf16.msra.mxu0 %v3191_v13 }
 0x8a2   : > { %2232 = vmatprep.subr.bf16.mxu0 %v3192_v63 }
 0x8a5   : > { %2233 = vmatpush1.bf16.msra.mxu0 %v3194_v2 }
 0x8a8   : > { %2251 = vmatmul.mubr.bf16.vlgmr.msra.gmra.mrb[0].mxu0 %v2125_v39 }
 0x8fc   : > { %v2328_v3 = vpop.permute.xlu0 %2327 }
 0x8fd   : > { %2786 = vmatpush3.bf16.msra.mxu1 %v2328_v3  ;;  %v2332_v4 = vpop.permute.xlu1 %2331 }
 0x8fe   : > { %2787 = vmatprep.subr.bf16.mxu1 %v3338_v45 }
 0x900   : > { %v2330_v16 = vpop.permute.xlu0 %2329 }
 0x901   : > { %2788 = vmatpush3.bf16.msra.mxu1 %v2330_v16  ;;  %v2334_v26 = vpop.permute.xlu1 %2333 }
 0x902   : > { %2789 = vmatprep.subr.bf16.mxu1 %v3338_v45 }
 0x904   : > { %v2336_v5 = vpop.permute.xlu0 %2335 }
 0x905   : > { %2790 = vmatpush3.bf16.msra.mxu1 %v2332_v4  ;;  %v2338_v6 = vpop.permute.xlu1 %2337 }
 0x906   : > { %2791 = vmatprep.subr.bf16.mxu1 %v3338_v45 }
 0x908   : > { %v2340_v21 = vpop.permute.xlu0 %2339 }
 0x909   : > { %2792 = vmatpush3.bf16.msra.mxu1 %v2334_v26  ;;  %v2342_v47 = vpop.permute.xlu1 %2341 }
 0x90a   : > { %2793 = vmatprep.subr.bf16.mxu1 %v3338_v45 }
 0x90d   : > { %2794 = vmatpush3.bf16.msra.mxu1 %v2336_v5 }
 0x90e   : > { %2795 = vmatprep.subr.bf16.mxu1 %v3338_v45 }
 0x911   : > { %2796 = vmatpush3.bf16.msra.mxu1 %v2338_v6 }
 0x912   : > { %2797 = vmatprep.subr.bf16.mxu1 %v3338_v45 }
 0x915   : > { %2798 = vmatpush3.bf16.msra.mxu1 %v2340_v21 }
 0x916   : > { %2799 = vmatprep.subr.bf16.mxu1 %v3338_v45 }
 0x919   : > { %2800 = vmatpush3.bf16.msra.mxu1 %v2342_v47 }
 0x97b   : > { %v2252_v8 = vpop.f32.mrb[0].mxu0 }
 0x97c   : > { %v2253_v9 = vadd.f32 %v2252_v8, %v2131_v61  ;;  %v2254_v27 = vpop.f32.mrb[1].mxu0 }
 0x97d   : > { %v2256_v51 = vpop.f32.mrb[2].mxu0  ;;  %v2255_v22 = vadd.f32 %v2254_v27, %v2135_v20 }
 0x97e   : > { %v2257_v10 = vadd.f32 %v2256_v51, %v2131_v61  ;;  %v2258_v11 = vpop.f32.mrb[3].mxu0  ;;  %v2261_v12 = vmax.f32 %v2253_v9, 0.0 }
 0x97f   : > { %v2259_v35 = vadd.f32 %v2258_v11, %v2135_v20 }
 0x980   : > { %v2262_v14 = vmax.f32 %v2257_v10, 0.0 }
 0x982   : > { %v2279_v17 = vpack.c.bf16 %v2262_v14, %v2261_v12 }
 0x984   : > { %2802 = vmatmul.mubr.bf16.vlgmr.msra.gmra.mrb[0].mxu1 %v2279_v17 }
 0xa57   : > { %v2385_v24 = vpop.f32.mrb[0].mxu1 }
 0xa58   : > { %v2386_v25 = vadd.f32 %v2706_v19, %v2385_v24  ;;  %v2803_v30 = vpop.f32.mrb[1].mxu1 }
 0xa59   : > { %v2388_v31 = vpop.f32.mrb[2].mxu1 }
 0xa5a   : > { %v2389_v32 = vadd.f32 %v2706_v19, %v2388_v31  ;;  %v2804_v18 = vpop.f32.mrb[3].mxu1  ;;  %v2393_v40 = vsel %vm2392_vm7, %v2386_v25, 0.0 }
 0xa5b   : > { %2394 = vadd.xlane.f32.xlu0 %v2393_v40 }
 0xa5c   : > { %v2396_v34 = vsel %vm2392_vm7, %v2389_v32, 0.0 }
 0xa5d   : > { %2397 = vadd.xlane.f32.xlu1 %v2396_v34 }
 0xa6e   : > { %2411 = vperm.xlu1 %3170, %v2259_v35  }
 0xa71   : > { %2406 = vperm.xlu0 %3169, %v2255_v22  }
 0xae8   : > { %v2395_v28 = vpop.xlane.xlu0 %2394 }
 0xae9   : > { %v2400_v38 = vmul.f32 0.125, %v2395_v28 }
 0xaea   : > { %v2398_v37 = vpop.xlane.xlu1 %2397 }
 0xaeb   : > { %v2401_v23 = vmul.f32 0.125, %v2398_v37  ;;  %v2402_v48 = vsub.f32 %v2386_v25, %v2400_v38 }
 0xaed   : > { %v2403_v41 = vsub.f32 %v2389_v32, %v2401_v23 }
 0xaee   : > { %v2412_v45 = vpop.permute.xlu1 %2411 }
 0xaef   : > { %v2415_v46 = vadd.f32 %v2412_v45, %v2403_v41 }
 0xaf0   : > { %v2407_v49 = vpop.permute.xlu0 %2406 }
 0xaf1   : > { %v2419_v56 = vmin.f32 %v2417_v0, %v2415_v46  ;;  %v2414_v50 = vadd.f32 %v2407_v49, %v2402_v48 }
 0xaf3   : > { %v2424_v33 = vsel %vm2422_vm8, %v2415_v46, %v2419_v56  ;;  %v2418_v52 = vmin.f32 %v2416_v42, %v2414_v50 }
 0xaf4   : > { %2426 = vst.msk [vmem:[%s3918_s3 + $0x8] sm:$0xff] %vm2392_vm7, %v2424_v33 }
 0xaf5   : > { %v2423_v53 = vsel %vm2422_vm8, %v2414_v50, %v2418_v52 }
 0xaf6   : > { %2425 = vst.msk [vmem:[%s3918_s3] sm:$0xff] %vm2392_vm7, %v2423_v53 }
 0xaf7 PF: > { %p2715_p0 = scmp.ne.s32.totalorder %s3381_s16, 1 }
 0xaf8   : > { %vm2431_vm9 = vcmask (!%p2715_p0), 64512   ;;  %s3341_s16 = smov (!%p2715_p0), 8   ;;  %vm2462_vm10 = vcmask (!%p2715_p0), 130112  }
 0xaf9   : > { %2430 = sbr.rel (%p2715_p0) target bundleno = 3243 (0xcab), region = 52  ;;  %v2432_v54 = vsel (!%p2715_p0), %vm2431_vm9, %v3818_v36, -inf  ;;  %v2435_v55 = vsel (!%p2715_p0), %vm2431_vm9, %v3820_v29, -inf }
 0xafa   : > { %2433 = vmax.xlane.f32.xlu0 (!%p2715_p0), %v2432_v54 }
 0xafe   : > { %2436 = vmax.xlane.f32.xlu0 (!%p2715_p0), %v2435_v55 }
 0xb87   : > { %v2434_v43 = vpop.xlane.xlu0 %2433 }
 0xb88   : > { %v2438_v1 = vsub.f32 %v3818_v36, %v2434_v43 }
 0xb8a   : > { %v2440_v57 = vmul.f32 1.442695, %v2438_v1 }
 0xb8b   : > { %v2437_v58 = vpop.xlane.xlu0 %2436 }
 0xb8c   : > { %3203 = vpow2.f32 %v2440_v57  ;;  %v2439_v59 = vsub.f32 %v3820_v29, %v2437_v58 }
 0xb8e   : > { %v2442_v60 = vmul.f32 1.442695, %v2439_v59 }
 0xb90   : > { %3205 = vpow2.f32 %v2442_v60 }
 0xb96   : > { %v3204_v62 = vpop.eup %3203 }
 0xb97   : > { %v2444_v13 = vsel %vm2431_vm9, %v3204_v62, 0.0 }
 0xb98   : > { %2445 = vadd.xlane.f32.xlu1 %v2444_v13 }
 0xb9a   : > { %v3206_v15 = vpop.eup %3205 }
 0xb9b   : > { %v2447_v63 = vsel %vm2431_vm9, %v3206_v15, 0.0 }
 0xb9c   : > { %2448 = vadd.xlane.f32.xlu1 %v2447_v63 }
 0xc25   : > { %v2446_v2 = vpop.xlane.xlu1 %2445 }
 0xc26   : > { %3207 = vrcp.f32 %v2446_v2 }
 0xc29   : > { %v2449_v39 = vpop.xlane.xlu1 %2448 }
 0xc2a   : > { %3209 = vrcp.f32 %v2449_v39 }
 0xc30   : > { %v3208_v36 = vpop.eup %3207 }
 0xc31   : > { %v2451_v3 = vmul.f32 %v3208_v36, %v3204_v62 }
 0xc33   : > { %2456 = vrot.lane.b32.xlu0 %v2451_v3, %s3341_s16 }
 0xc34   : > { %v3210_v16 = vpop.eup %3209 }
 0xc35   : > { %v2453_v29 = vmul.f32 %v3210_v16, %v3206_v15 }
 0xc37   : > { %2458 = vrot.lane.b32.xlu1 %v2453_v29, %s3341_s16 }
 0xca5   : > { %v2457_v4 = vpop.permute.xlu0 %2456 }
 0xca6   : > { %2463 = vst.msk [vmem:[%s3918_s3] sm:$0xff] %vm2462_vm10, %v2457_v4 }
 0xca9   : > { %v2459_v26 = vpop.permute.xlu1 %2458 }
 0xcaa   : > { %2464 = vst.msk [vmem:[%s3918_s3 + $0x8] sm:$0xff] %vm2462_vm10, %v2459_v26 }
 0xcab PF: > { %p16_p1 = scmp.ge.s32.totalorder %s3384_s17, 4   ;;  %s3928_s12 = smov %s3301_s13 }
 0xcac   : > { %s3929_s13 = smov %s3305_s14  ;;  %s3930_s14 = smov %s3394_s20 }
 0xcad   : > { %s3931_s15 = smov %s3384_s17  ;;  %18 = sbr.rel (!%p16_p1) target bundleno = 5 (0x5), region = 93 }
 0xcb4   :  { %2476 = vsyncpa [#allocation3], 1 }
 0xcb5   :  { %2478 = vsyncpa [#allocation3 + $0x1], 1 }
 0xcb6   :  { %2479 = vsyncpa [#allocation5], 1 }
 0xcb7   :  { %2481 = vsyncpa [#allocation5 + $0x1], 1 }

</bundles_post_ra>
